<compile_context>
chip_gen: v6e
topology: v6e:2x2x1
jax: 0.10.0
libtpu: 0.0.40
codegen_flags: <defaults>
</compile_context>

<pallas_src>
import jax
import jax.numpy as jnp
from jax.experimental import pallas as pl
from jax.experimental.pallas import tpu as pltpu


def _round_up(x: int, m: int) -> int:
    return ((x + m - 1) // m) * m


def _attn_agg_kernel(x_ref, m_ref, w1_ref, b1_ref, w2_ref, b2_ref, o_ref):
    # x_ref: (TN*Lp, D)  m_ref: (TN*Lp, 1)  w1_ref: (D, F)  b1_ref/w2_ref: (1, F)
    # b2_ref: (1, 1)     o_ref: (TN, D)
    tn, _ = o_ref.shape
    rows, _ = x_ref.shape
    lp = rows // tn

    x = x_ref[...]                                   # keep input dtype (bf16-friendly)
    w1 = w1_ref[...]
    b1 = b1_ref[...].astype(jnp.float32)             # (1, F)
    w2 = w2_ref[...].astype(jnp.float32)             # (1, F)
    b2 = b2_ref[...].astype(jnp.float32)             # (1, 1)

    # Scoring MLP: MXU for D->2D projection (f32 accumulate), VPU+lane-reduce for w2.
    h = jnp.tanh(jnp.dot(x, w1, preferred_element_type=jnp.float32) + b1)   # (R, F) f32
    e = jnp.sum(h * w2, axis=1, keepdims=True) + b2                          # (R, 1) f32

    valid = m_ref[...] > 0.0                                                 # (R, 1)
    e = jnp.where(valid, e, -1e9)

    # Block-global max is a valid softmax stabilizer here: scores are tanh-bounded,
    # so the spread across the block is tiny; masked entries underflow to exactly 0.
    gmax = jnp.max(e, axis=0, keepdims=True)                                 # (1, 1)
    p = jnp.exp(e - gmax)                                                    # (R, 1)
    xw = p * x                                                               # (R, D) f32

    # Per-sequence segment reduction over the Lp rows of each of the TN sequences
    # (static unroll; slices are sublane-tile aligned since Lp % 8 == 0).
    for n in range(tn):
        sl = slice(n * lp, (n + 1) * lp)
        num = jnp.sum(xw[sl, :], axis=0, keepdims=True)                      # (1, D)
        den = jnp.sum(p[sl, :], axis=0, keepdims=True)                       # (1, 1)
        den = jnp.maximum(den, 1e-30)                # only hits fully-padded rows
        o_ref[n:n + 1, :] = (num / den).astype(o_ref.dtype)


def attention_aggregator_wo_feature(x, mask, w1, b1, w2, b2, *, tn: int = 8):
    """
    x:    [B, K, L, D]   mask: [B, K, L]  (nonzero = valid)
    w1:   [2D, D]  b1: [2D]      (PyTorch nn.Linear(D, 2D))
    w2:   [1, 2D]  b2: [1]       (PyTorch nn.Linear(2D, 1))
    returns [B, K, D]
    """
    B, K, L, D = x.shape
    F = w1.shape[0]
    N = B * K
    lp = _round_up(L, 8)            # time axis padded to a sublane multiple
    np_ = _round_up(N, tn)          # sequence axis padded to the block size

    xf = x.reshape(N, L, D)
    mf = mask.reshape(N, L).astype(jnp.float32)
    # Padded positions get mask = 0 so they cannot contribute to the softmax.
    xf = jnp.pad(xf, ((0, np_ - N), (0, lp - L), (0, 0)))
    mf = jnp.pad(mf, ((0, np_ - N), (0, lp - L)))

    x2 = xf.reshape(np_ * lp, D)    # D lane-dense, rows on sublanes
    m2 = mf.reshape(np_ * lp, 1)

    w1t = w1.T                      # (D, F)
    b1r = b1.reshape(1, F)
    w2r = w2.reshape(1, F)
    b2r = b2.reshape(1, 1)

    rows_per_block = tn * lp
    grid = (np_ // tn,)

    flops = 2 * np_ * lp * D * F + 3 * np_ * lp * F + 2 * np_ * lp * D
    bytes_accessed = int(x2.size * x2.dtype.itemsize + m2.size * 4 +
                         w1t.size * w1t.dtype.itemsize + 2 * F * 4 +
                         np_ * D * x.dtype.itemsize)
    cost = pl.CostEstimate(flops=int(flops),
                           transcendentals=int(2 * np_ * lp),
                           bytes_accessed=bytes_accessed)

    out = pl.pallas_call(
        _attn_agg_kernel,
        out_shape=jax.ShapeDtypeStruct((np_, D), x.dtype),
        grid_spec=pltpu.PrefetchScalarGridSpec(
            num_scalar_prefetch=0,
            grid=grid,
            in_specs=[
                pl.BlockSpec((rows_per_block, D), lambda i: (i, 0)),
                pl.BlockSpec((rows_per_block, 1), lambda i: (i, 0)),
                pl.BlockSpec((D, F), lambda i: (0, 0)),   # weights stay resident
                pl.BlockSpec((1, F), lambda i: (0, 0)),
                pl.BlockSpec((1, F), lambda i: (0, 0)),
                pl.BlockSpec((1, 1), lambda i: (0, 0)),
            ],
            out_specs=pl.BlockSpec((tn, D), lambda i: (i, 0)),
        ),
        compiler_params=pltpu.CompilerParams(
            dimension_semantics=("parallel",),          # megacore on multi-TC chips
            vmem_limit_bytes=48 * 1024 * 1024,
        ),
        cost_estimate=cost,
    )(x2, m2, w1t, b1r, w2r, b2r)

    return out[:N].reshape(B, K, D)


if __name__ == "__main__":
    # Small shapes consistent with the module: [B, K, L, D], dim = 32 -> attn hidden 64.
    B, K, L, D = 2, 16, 24, 32
    F = 2 * D

    key = jax.random.PRNGKey(0)
    kx, km, k1, k2, k3, k4 = jax.random.split(key, 6)

    x = jax.random.normal(kx, (B, K, L, D), dtype=jnp.float32)
    mask = (jax.random.uniform(km, (B, K, L)) > 0.3).astype(jnp.float32)
    mask = mask.at[..., 0].set(1.0)          # guarantee >= 1 valid step per (b, k)

    # Deterministic synthetic Linear parameters (PyTorch layout conventions).
    w1 = jax.random.normal(k1, (F, D), dtype=jnp.float32) / jnp.sqrt(float(D))
    b1 = jax.random.normal(k2, (F,), dtype=jnp.float32) * 0.01
    w2 = jax.random.normal(k3, (1, F), dtype=jnp.float32) / jnp.sqrt(float(F))
    b2 = jax.random.normal(k4, (1,), dtype=jnp.float32) * 0.01

    out = jax.jit(attention_aggregator_wo_feature)(x, mask, w1, b1, w2, b2)
    out = jax.block_until_ready(out)

    # Pure-JAX reference (masked MLP-attention pooling over L).
    h = jnp.tanh(jnp.einsum('bkld,fd->bklf', x, w1) + b1)
    e = jnp.einsum('bklf,f->bkl', h, w2[0]) + b2[0]
    e = jnp.where(mask > 0, e, -1e9)
    a = jax.nn.softmax(e, axis=-1)
    ref = jnp.einsum('bkl,bkld->bkd', a, x)

    assert out.shape == (B, K, D)
    assert jnp.allclose(out, ref, atol=1e-3, rtol=1e-3), float(jnp.max(jnp.abs(out - ref)))

    print("KERNEL_OK")
</pallas_src>

<mosaic_0001>
module attributes {stable_mosaic.version = 11 : i64} {
  func.func @_attn_agg_kernel(%arg0: i32, %arg1: memref<192x32xf32, #tpu.memory_space<vmem>>, %arg2: memref<192x1xf32, #tpu.memory_space<vmem>>, %arg3: memref<32x64xf32, #tpu.memory_space<vmem>>, %arg4: memref<1x64xf32, #tpu.memory_space<vmem>>, %arg5: memref<1x64xf32, #tpu.memory_space<vmem>>, %arg6: memref<1x1xf32, #tpu.memory_space<vmem>>, %arg7: memref<8x32xf32, #tpu.memory_space<vmem>>) attributes {dimension_semantics = [#tpu.dimension_semantics<parallel>], iteration_bounds = array<i64: 4>, scalar_prefetch = 0 : i64, scratch_operands = 0 : i64, tpu.core_type = #tpu.core_type<tc>, window_params = [{transform_indices = @transform_0, window_bounds = array<i64: 192, 32>}, {transform_indices = @transform_1, window_bounds = array<i64: 192, 1>}, {pipeline_mode = #tpu.pipeline_mode<synchronous>, transform_indices = @transform_2, window_bounds = array<i64: 32, 64>}, {pipeline_mode = #tpu.pipeline_mode<synchronous>, transform_indices = @transform_3, window_bounds = array<i64: 1, 64>}, {pipeline_mode = #tpu.pipeline_mode<synchronous>, transform_indices = @transform_4, window_bounds = array<i64: 1, 64>}, {pipeline_mode = #tpu.pipeline_mode<synchronous>, transform_indices = @transform_5, window_bounds = array<i64: 1, 1>}, {transform_indices = @transform_6, window_bounds = array<i64: 8, 32>}]} {
    %c0 = arith.constant 0 : index
    %c0_0 = arith.constant 0 : index
    %0 = vector.load %arg1[%c0, %c0_0] : memref<192x32xf32, #tpu.memory_space<vmem>>, vector<192x32xf32>
    %c0_1 = arith.constant 0 : index
    %c0_2 = arith.constant 0 : index
    %1 = vector.load %arg3[%c0_1, %c0_2] : memref<32x64xf32, #tpu.memory_space<vmem>>, vector<32x64xf32>
    %c0_3 = arith.constant 0 : index
    %c0_4 = arith.constant 0 : index
    %2 = vector.load %arg4[%c0_3, %c0_4] : memref<1x64xf32, #tpu.memory_space<vmem>>, vector<1x64xf32>
    %c0_5 = arith.constant 0 : index
    %c0_6 = arith.constant 0 : index
    %3 = vector.load %arg5[%c0_5, %c0_6] : memref<1x64xf32, #tpu.memory_space<vmem>>, vector<1x64xf32>
    %c0_7 = arith.constant 0 : index
    %c0_8 = arith.constant 0 : index
    %4 = vector.load %arg6[%c0_7, %c0_8] : memref<1x1xf32, #tpu.memory_space<vmem>>, vector<1x1xf32>
    %cst = arith.constant dense<0.000000e+00> : vector<192x64xf32>
    %5 = tpu.matmul %0, %1, %cst {dimension_numbers = #tpu.dot_dimension_numbers<[1], [0], [0], [1], [0, 0, 1, 1], [], []>} : vector<192x32xf32>, vector<32x64xf32>, vector<192x64xf32> -> vector<192x64xf32>
    %6 = vector.broadcast %2 : vector<1x64xf32> to vector<192x64xf32>
    %7 = arith.addf %5, %6 : vector<192x64xf32>
    %8 = math.tanh %7 : vector<192x64xf32>
    %9 = vector.broadcast %3 : vector<1x64xf32> to vector<192x64xf32>
    %10 = arith.mulf %8, %9 : vector<192x64xf32>
    %cst_9 = arith.constant dense<0.000000e+00> : vector<192xf32>
    %11 = vector.multi_reduction <add>, %10, %cst_9 [1] : vector<192x64xf32> to vector<192xf32>
    %12 = vector.shape_cast %11 : vector<192xf32> to vector<192x1xf32>
    %13 = vector.broadcast %4 : vector<1x1xf32> to vector<192x1xf32>
    %14 = arith.addf %12, %13 : vector<192x1xf32>
    %c0_10 = arith.constant 0 : index
    %c0_11 = arith.constant 0 : index
    %15 = vector.load %arg2[%c0_10, %c0_11] : memref<192x1xf32, #tpu.memory_space<vmem>>, vector<192x1xf32>
    %cst_12 = arith.constant 0.000000e+00 : f32
    %16 = vector.broadcast %cst_12 : f32 to vector<192x1xf32>
    %17 = arith.cmpf ogt, %15, %16 : vector<192x1xf32>
    %cst_13 = arith.constant -1.000000e+09 : f32
    %18 = vector.broadcast %cst_13 : f32 to vector<192x1xf32>
    %19 = arith.select %17, %14, %18 : vector<192x1xi1>, vector<192x1xf32>
    %cst_14 = arith.constant dense<0xFF800000> : vector<1xf32>
    %20 = vector.multi_reduction <maximumf>, %19, %cst_14 [0] : vector<192x1xf32> to vector<1xf32>
    %21 = vector.shape_cast %20 : vector<1xf32> to vector<1x1xf32>
    %22 = vector.broadcast %21 : vector<1x1xf32> to vector<192x1xf32>
    %23 = arith.subf %19, %22 : vector<192x1xf32>
    %24 = math.exp %23 : vector<192x1xf32>
    %25 = vector.broadcast %24 : vector<192x1xf32> to vector<192x32xf32>
    %26 = arith.mulf %25, %0 : vector<192x32xf32>
    %27 = vector.extract_strided_slice %26 {offsets = [0, 0], sizes = [24, 32], strides = [1, 1]} : vector<192x32xf32> to vector<24x32xf32>
    %cst_15 = arith.constant dense<0.000000e+00> : vector<32xf32>
    %28 = vector.multi_reduction <add>, %27, %cst_15 [0] : vector<24x32xf32> to vector<32xf32>
    %29 = vector.shape_cast %28 : vector<32xf32> to vector<1x32xf32>
    %30 = vector.extract_strided_slice %24 {offsets = [0, 0], sizes = [24, 1], strides = [1, 1]} : vector<192x1xf32> to vector<24x1xf32>
    %cst_16 = arith.constant dense<0.000000e+00> : vector<1xf32>
    %31 = vector.multi_reduction <add>, %30, %cst_16 [0] : vector<24x1xf32> to vector<1xf32>
    %32 = vector.shape_cast %31 : vector<1xf32> to vector<1x1xf32>
    %cst_17 = arith.constant 1.000000e-30 : f32
    %33 = vector.broadcast %cst_17 : f32 to vector<1x1xf32>
    %34 = arith.maximumf %32, %33 : vector<1x1xf32>
    %35 = vector.broadcast %34 : vector<1x1xf32> to vector<1x32xf32>
    %36 = arith.divf %29, %35 : vector<1x32xf32>
    %c0_18 = arith.constant 0 : index
    %c0_19 = arith.constant 0 : index
    %37 = vector.load %arg7[%c0_18, %c0_19] : memref<8x32xf32, #tpu.memory_space<vmem>>, vector<1x32xf32>
    tpu.vector_store %arg7[%c0_18, %c0_19], %36 {strides = array<i32>} : memref<8x32xf32, #tpu.memory_space<vmem>>, vector<1x32xf32>,
    %38 = vector.extract_strided_slice %26 {offsets = [24, 0], sizes = [24, 32], strides = [1, 1]} : vector<192x32xf32> to vector<24x32xf32>
    %cst_20 = arith.constant dense<0.000000e+00> : vector<32xf32>
    %39 = vector.multi_reduction <add>, %38, %cst_20 [0] : vector<24x32xf32> to vector<32xf32>
    %40 = vector.shape_cast %39 : vector<32xf32> to vector<1x32xf32>
    %41 = vector.extract_strided_slice %24 {offsets = [24, 0], sizes = [24, 1], strides = [1, 1]} : vector<192x1xf32> to vector<24x1xf32>
    %cst_21 = arith.constant dense<0.000000e+00> : vector<1xf32>
    %42 = vector.multi_reduction <add>, %41, %cst_21 [0] : vector<24x1xf32> to vector<1xf32>
    %43 = vector.shape_cast %42 : vector<1xf32> to vector<1x1xf32>
    %cst_22 = arith.constant 1.000000e-30 : f32
    %44 = vector.broadcast %cst_22 : f32 to vector<1x1xf32>
    %45 = arith.maximumf %43, %44 : vector<1x1xf32>
    %46 = vector.broadcast %45 : vector<1x1xf32> to vector<1x32xf32>
    %47 = arith.divf %40, %46 : vector<1x32xf32>
    %c1 = arith.constant 1 : index
    %c0_23 = arith.constant 0 : index
    %48 = vector.load %arg7[%c1, %c0_23] : memref<8x32xf32, #tpu.memory_space<vmem>>, vector<1x32xf32>
    tpu.vector_store %arg7[%c1, %c0_23], %47 {strides = array<i32>} : memref<8x32xf32, #tpu.memory_space<vmem>>, vector<1x32xf32>,
    %49 = vector.extract_strided_slice %26 {offsets = [48, 0], sizes = [24, 32], strides = [1, 1]} : vector<192x32xf32> to vector<24x32xf32>
    %cst_24 = arith.constant dense<0.000000e+00> : vector<32xf32>
    %50 = vector.multi_reduction <add>, %49, %cst_24 [0] : vector<24x32xf32> to vector<32xf32>
    %51 = vector.shape_cast %50 : vector<32xf32> to vector<1x32xf32>
    %52 = vector.extract_strided_slice %24 {offsets = [48, 0], sizes = [24, 1], strides = [1, 1]} : vector<192x1xf32> to vector<24x1xf32>
    %cst_25 = arith.constant dense<0.000000e+00> : vector<1xf32>
    %53 = vector.multi_reduction <add>, %52, %cst_25 [0] : vector<24x1xf32> to vector<1xf32>
    %54 = vector.shape_cast %53 : vector<1xf32> to vector<1x1xf32>
    %cst_26 = arith.constant 1.000000e-30 : f32
    %55 = vector.broadcast %cst_26 : f32 to vector<1x1xf32>
    %56 = arith.maximumf %54, %55 : vector<1x1xf32>
    %57 = vector.broadcast %56 : vector<1x1xf32> to vector<1x32xf32>
    %58 = arith.divf %51, %57 : vector<1x32xf32>
    %c2 = arith.constant 2 : index
    %c0_27 = arith.constant 0 : index
    %59 = vector.load %arg7[%c2, %c0_27] : memref<8x32xf32, #tpu.memory_space<vmem>>, vector<1x32xf32>
    tpu.vector_store %arg7[%c2, %c0_27], %58 {strides = array<i32>} : memref<8x32xf32, #tpu.memory_space<vmem>>, vector<1x32xf32>,
    %60 = vector.extract_strided_slice %26 {offsets = [72, 0], sizes = [24, 32], strides = [1, 1]} : vector<192x32xf32> to vector<24x32xf32>
    %cst_28 = arith.constant dense<0.000000e+00> : vector<32xf32>
    %61 = vector.multi_reduction <add>, %60, %cst_28 [0] : vector<24x32xf32> to vector<32xf32>
    %62 = vector.shape_cast %61 : vector<32xf32> to vector<1x32xf32>
    %63 = vector.extract_strided_slice %24 {offsets = [72, 0], sizes = [24, 1], strides = [1, 1]} : vector<192x1xf32> to vector<24x1xf32>
    %cst_29 = arith.constant dense<0.000000e+00> : vector<1xf32>
    %64 = vector.multi_reduction <add>, %63, %cst_29 [0] : vector<24x1xf32> to vector<1xf32>
    %65 = vector.shape_cast %64 : vector<1xf32> to vector<1x1xf32>
    %cst_30 = arith.constant 1.000000e-30 : f32
    %66 = vector.broadcast %cst_30 : f32 to vector<1x1xf32>
    %67 = arith.maximumf %65, %66 : vector<1x1xf32>
    %68 = vector.broadcast %67 : vector<1x1xf32> to vector<1x32xf32>
    %69 = arith.divf %62, %68 : vector<1x32xf32>
    %c3 = arith.constant 3 : index
    %c0_31 = arith.constant 0 : index
    %70 = vector.load %arg7[%c3, %c0_31] : memref<8x32xf32, #tpu.memory_space<vmem>>, vector<1x32xf32>
    tpu.vector_store %arg7[%c3, %c0_31], %69 {strides = array<i32>} : memref<8x32xf32, #tpu.memory_space<vmem>>, vector<1x32xf32>,
    %71 = vector.extract_strided_slice %26 {offsets = [96, 0], sizes = [24, 32], strides = [1, 1]} : vector<192x32xf32> to vector<24x32xf32>
    %cst_32 = arith.constant dense<0.000000e+00> : vector<32xf32>
    %72 = vector.multi_reduction <add>, %71, %cst_32 [0] : vector<24x32xf32> to vector<32xf32>
    %73 = vector.shape_cast %72 : vector<32xf32> to vector<1x32xf32>
    %74 = vector.extract_strided_slice %24 {offsets = [96, 0], sizes = [24, 1], strides = [1, 1]} : vector<192x1xf32> to vector<24x1xf32>
    %cst_33 = arith.constant dense<0.000000e+00> : vector<1xf32>
    %75 = vector.multi_reduction <add>, %74, %cst_33 [0] : vector<24x1xf32> to vector<1xf32>
    %76 = vector.shape_cast %75 : vector<1xf32> to vector<1x1xf32>
    %cst_34 = arith.constant 1.000000e-30 : f32
    %77 = vector.broadcast %cst_34 : f32 to vector<1x1xf32>
    %78 = arith.maximumf %76, %77 : vector<1x1xf32>
    %79 = vector.broadcast %78 : vector<1x1xf32> to vector<1x32xf32>
    %80 = arith.divf %73, %79 : vector<1x32xf32>
    %c4 = arith.constant 4 : index
    %c0_35 = arith.constant 0 : index
    %81 = vector.load %arg7[%c4, %c0_35] : memref<8x32xf32, #tpu.memory_space<vmem>>, vector<1x32xf32>
    tpu.vector_store %arg7[%c4, %c0_35], %80 {strides = array<i32>} : memref<8x32xf32, #tpu.memory_space<vmem>>, vector<1x32xf32>,
    %82 = vector.extract_strided_slice %26 {offsets = [120, 0], sizes = [24, 32], strides = [1, 1]} : vector<192x32xf32> to vector<24x32xf32>
    %cst_36 = arith.constant dense<0.000000e+00> : vector<32xf32>
    %83 = vector.multi_reduction <add>, %82, %cst_36 [0] : vector<24x32xf32> to vector<32xf32>
    %84 = vector.shape_cast %83 : vector<32xf32> to vector<1x32xf32>
    %85 = vector.extract_strided_slice %24 {offsets = [120, 0], sizes = [24, 1], strides = [1, 1]} : vector<192x1xf32> to vector<24x1xf32>
    %cst_37 = arith.constant dense<0.000000e+00> : vector<1xf32>
    %86 = vector.multi_reduction <add>, %85, %cst_37 [0] : vector<24x1xf32> to vector<1xf32>
    %87 = vector.shape_cast %86 : vector<1xf32> to vector<1x1xf32>
    %cst_38 = arith.constant 1.000000e-30 : f32
    %88 = vector.broadcast %cst_38 : f32 to vector<1x1xf32>
    %89 = arith.maximumf %87, %88 : vector<1x1xf32>
    %90 = vector.broadcast %89 : vector<1x1xf32> to vector<1x32xf32>
    %91 = arith.divf %84, %90 : vector<1x32xf32>
    %c5 = arith.constant 5 : index
    %c0_39 = arith.constant 0 : index
    %92 = vector.load %arg7[%c5, %c0_39] : memref<8x32xf32, #tpu.memory_space<vmem>>, vector<1x32xf32>
    tpu.vector_store %arg7[%c5, %c0_39], %91 {strides = array<i32>} : memref<8x32xf32, #tpu.memory_space<vmem>>, vector<1x32xf32>,
    %93 = vector.extract_strided_slice %26 {offsets = [144, 0], sizes = [24, 32], strides = [1, 1]} : vector<192x32xf32> to vector<24x32xf32>
    %cst_40 = arith.constant dense<0.000000e+00> : vector<32xf32>
    %94 = vector.multi_reduction <add>, %93, %cst_40 [0] : vector<24x32xf32> to vector<32xf32>
    %95 = vector.shape_cast %94 : vector<32xf32> to vector<1x32xf32>
    %96 = vector.extract_strided_slice %24 {offsets = [144, 0], sizes = [24, 1], strides = [1, 1]} : vector<192x1xf32> to vector<24x1xf32>
    %cst_41 = arith.constant dense<0.000000e+00> : vector<1xf32>
    %97 = vector.multi_reduction <add>, %96, %cst_41 [0] : vector<24x1xf32> to vector<1xf32>
    %98 = vector.shape_cast %97 : vector<1xf32> to vector<1x1xf32>
    %cst_42 = arith.constant 1.000000e-30 : f32
    %99 = vector.broadcast %cst_42 : f32 to vector<1x1xf32>
    %100 = arith.maximumf %98, %99 : vector<1x1xf32>
    %101 = vector.broadcast %100 : vector<1x1xf32> to vector<1x32xf32>
    %102 = arith.divf %95, %101 : vector<1x32xf32>
    %c6 = arith.constant 6 : index
    %c0_43 = arith.constant 0 : index
    %103 = vector.load %arg7[%c6, %c0_43] : memref<8x32xf32, #tpu.memory_space<vmem>>, vector<1x32xf32>
    tpu.vector_store %arg7[%c6, %c0_43], %102 {strides = array<i32>} : memref<8x32xf32, #tpu.memory_space<vmem>>, vector<1x32xf32>,
    %104 = vector.extract_strided_slice %26 {offsets = [168, 0], sizes = [24, 32], strides = [1, 1]} : vector<192x32xf32> to vector<24x32xf32>
    %cst_44 = arith.constant dense<0.000000e+00> : vector<32xf32>
    %105 = vector.multi_reduction <add>, %104, %cst_44 [0] : vector<24x32xf32> to vector<32xf32>
    %106 = vector.shape_cast %105 : vector<32xf32> to vector<1x32xf32>
    %107 = vector.extract_strided_slice %24 {offsets = [168, 0], sizes = [24, 1], strides = [1, 1]} : vector<192x1xf32> to vector<24x1xf32>
    %cst_45 = arith.constant dense<0.000000e+00> : vector<1xf32>
    %108 = vector.multi_reduction <add>, %107, %cst_45 [0] : vector<24x1xf32> to vector<1xf32>
    %109 = vector.shape_cast %108 : vector<1xf32> to vector<1x1xf32>
    %cst_46 = arith.constant 1.000000e-30 : f32
    %110 = vector.broadcast %cst_46 : f32 to vector<1x1xf32>
    %111 = arith.maximumf %109, %110 : vector<1x1xf32>
    %112 = vector.broadcast %111 : vector<1x1xf32> to vector<1x32xf32>
    %113 = arith.divf %106, %112 : vector<1x32xf32>
    %c7 = arith.constant 7 : index
    %c0_47 = arith.constant 0 : index
    %114 = vector.load %arg7[%c7, %c0_47] : memref<8x32xf32, #tpu.memory_space<vmem>>, vector<1x32xf32>
    tpu.vector_store %arg7[%c7, %c0_47], %113 {strides = array<i32>} : memref<8x32xf32, #tpu.memory_space<vmem>>, vector<1x32xf32>,
    return
  }
  func.func @transform_0(%arg0: i32) -> (i32, i32) {
    %c0_i32 = arith.constant 0 : i32
    %c0_i32_0 = arith.constant 0 : i32
    return %arg0, %c0_i32 : i32, i32
  }
  func.func @transform_1(%arg0: i32) -> (i32, i32) {
    %c0_i32 = arith.constant 0 : i32
    %c0_i32_0 = arith.constant 0 : i32
    return %arg0, %c0_i32 : i32, i32
  }
  func.func @transform_2(%arg0: i32) -> (i32, i32) {
    %c0_i32 = arith.constant 0 : i32
    %c0_i32_0 = arith.constant 0 : i32
    %c0_i32_1 = arith.constant 0 : i32
    return %c0_i32, %c0_i32_0 : i32, i32
  }
  func.func @transform_3(%arg0: i32) -> (i32, i32) {
    %c0_i32 = arith.constant 0 : i32
    %c0_i32_0 = arith.constant 0 : i32
    %c0_i32_1 = arith.constant 0 : i32
    return %c0_i32, %c0_i32_0 : i32, i32
  }
  func.func @transform_4(%arg0: i32) -> (i32, i32) {
    %c0_i32 = arith.constant 0 : i32
    %c0_i32_0 = arith.constant 0 : i32
    %c0_i32_1 = arith.constant 0 : i32
    return %c0_i32, %c0_i32_0 : i32, i32
  }
  func.func @transform_5(%arg0: i32) -> (i32, i32) {
    %c0_i32 = arith.constant 0 : i32
    %c0_i32_0 = arith.constant 0 : i32
    %c0_i32_1 = arith.constant 0 : i32
    return %c0_i32, %c0_i32_0 : i32, i32
  }
  func.func @transform_6(%arg0: i32) -> (i32, i32) {
    %c0_i32 = arith.constant 0 : i32
    %c0_i32_0 = arith.constant 0 : i32
    return %arg0, %c0_i32 : i32, i32
  }
}

</mosaic_0001>

<bundles_post_ra>
// kernel: attention_aggregator_wo_feature.1
= control target key start
LH: loop header
LB: loop body
LE: loop exit
PB: predicated region body
PF: predicated region fallthrough
CT: control target
= control target key end

     0   :  { %s2487_s0 = inlined_call_operand.vmem [shape: f32[768,32], index: 0, kind: input, shape index: {}]   ;;  %s2488_s1 = inlined_call_operand.vmem [shape: f32[768,1], index: 1, kind: input, shape index: {}]   ;;  %s2489_s2 = inlined_call_operand.vmem [shape: f32[32,64], index: 2, kind: input, shape index: {}]   ;;  %s2490_s3 = inlined_call_operand.vmem [shape: f32[1,64], index: 3, kind: input, shape index: {}]   ;;  %s2491_s4 = inlined_call_operand.vmem [shape: f32[1,64], index: 4, kind: input, shape index: {}]   ;;  %s2492_s5 = inlined_call_operand.<no memory space> [shape: f32[1,1], index: 5, kind: input, shape index: {}]   ;;  %s2493_s6 = inlined_call_operand.hbm [shape: f32[32,32], index: 6, kind: output, shape index: {}]  }
   0x1   :  { %v11_v0 = vstv %s2492_s5 }
   0x2   :  { %12 = vst [vmem:[#allocation2] sm:$0x1] %v11_v0 }
   0x3   :  { %13 = vsyncpa [#allocation4], 0 }
   0x4   :  { %15 = vsyncpa [#allocation4 + $0x1], 0  ;;  %s1802_s23 = smov 0   ;;  %s1804_s24 = smov 0  }
   0x5   :  { %s1806_s25 = smov 0   ;;  %s1808_s26 = smov 0  }
   0x6 LB: > { %s1823_s5 = sadd.s32 4294967295, %s1760_s26   ;;  %s1404_s27 = sadd.s32 4294967294, %s1760_s26   ;;  %s1760_s26 = sphi %s1808_s26, %s2523_s26   ;;  %s1756_s25 = sphi %s1806_s25, %s2522_s25   ;;  %s1752_s24 = sphi %s1804_s24, %s2521_s24   ;;  %s1748_s23 = sphi %s1802_s23, %s2520_s23  }
   0x7   : > { %s1827_s28 = sadd.s32 1, %s1760_s26   ;;  %s164_s29 = sadd.s32 1, %s1756_s25 }
   0x8   : > { %s161_s30 = ssub.s32 %s1760_s26, %s1827_s28  ;;  %p174_p0 = scmp.ne.s32.totalorder %s1756_s25, %s1752_s24 }
   0x9   : > { %p162_p1 = scmp.eq.s32.totalorder %s161_s30, 0  ;;  %p175_p2 = scmp.eq.s32.totalorder %s1823_s5, 3 }
   0xa   : > { %p180_p3 = scmp.ne.s32.totalorder %s1752_s24, %s1748_s23  ;;  %p181_p4 = scmp.eq.s32.totalorder %s1404_s27, 3 }
   0xb   : > { %s1838_s7 = scalar_select %p162_p1, %s1756_s25, %s164_s29  }
   0xc   : > { %p1840_p5 = por %p175_p2, %p174_p0  ;;  %p1844_p6 = por %p181_p4, %p180_p3 }
   0xd   : > { %p1407_p7 = scmp.ge.s32.totalorder %s1760_s26, 1  ;;  %p229_p8 = scmp.lt.s32.totalorder %s1760_s26, 5 }
   0xf   : > { %p230_p9 = pnand %p1407_p7, %p229_p8 }
  0x10   : > { %s264_s14 = smul.u32 (!%p230_p9), 24, %s1823_s5  ;;  %s1439_s17 = sshll.u32 (!%p230_p9), %s1823_s5, 7 }
  0x11   : > { %233 = sbr.rel (%p230_p9) target bundleno = 692 (0x2b4), region = 44  ;;  %s1331_s21 = scalar_lea.hbm (!%p230_p9), %s2493_s6, %s1439_s17 }
  0x12   : > { %p265_p10 = scmp.lt.s32.totalorder (!%p230_p9), %s264_s14, 95  ;;  %s1763_s5 = smov (!%p230_p9), [#allocation3]  }
  0x13   : > { %s1704_s29 = sshll.u32 (!%p230_p9), %s1763_s5, 4  ;;  %s1705_s29 = int_to_ptr.vmem [resolvable:$false] %s1704_s29 }
  0x14   : > { %s1706_s30 = scalar_lea.vmem (!%p230_p9), %s1705_s29, 256 }
  0x16   : > { %v303_v1 = vld [vmem:[%s2489_s2 + $0x18] sm:$0xff]  ;;  %v302_v2 = vld [vmem:[%s2489_s2 + $0x10] sm:$0xff]  ;;  %v301_v3 = vld [vmem:[%s2489_s2 + $0x8] sm:$0xff]  ;;  %s2525_s14 = smov (!%p265_p10, %s264_s14), 95  ;;  %vm2494_vm0 = vcmask 261120   ;;  %vm625_vm1 = vcmask 523264  }
  0x17   : > { %1470 = vmatprep.subr.mxu0 %v303_v1  ;;  %1514 = vmatprep.subr.mxu1 %v303_v1  ;;  %v300_v4 = vld [vmem:[%s2489_s2] sm:$0xff]  ;;  %s1409_s19 = sshll.u32 %s2525_s14, 3  ;;  %vm800_vm3 = vcmask 7168   ;;  %s261_s14 = sand.u32 1, %s1752_s24  }
  0x18   : > { %1471 = vmatpush3.msra.mxu0 %v303_v1  ;;  %1518 = vmatpush3.msra.mxu1 %v303_v1  ;;  %s1871_s22 = scalar_lea.vmem %s2487_s0, %s1409_s19  ;;  %v1924_v29 = vld [vmem:[%s2490_s3] ss:$0 sm:$0xff]  ;;  %s2010_s13 = scalar_lea.vmem %s2488_s1, %s1409_s19 }
  0x19   : > { %1472 = vmatprep.subr.mxu0 %v302_v2  ;;  %1515 = vmatprep.subr.mxu1 %v302_v2  ;;  %v276_v5 = vld [vmem:[%s1871_s22] sm:$0xff]  ;;  %v277_v7 = vld [vmem:[%s1871_s22 + $0x8] sm:$0xff]  ;;  %v278_v9 = vld [vmem:[%s1871_s22 + $0x10] sm:$0xff]  ;;  %s2410_s15 = sshll.u32 %s261_s14, 3 }
  0x1a   : > { %1473 = vmatpush3.msra.mxu0 %v302_v2  ;;  %1519 = vmatpush3.msra.mxu1 %v302_v2  ;;  %v288_v6 = vld [vmem:[%s1871_s22 + $0x60] sm:$0xff]  ;;  %v289_v8 = vld [vmem:[%s1871_s22 + $0x68] sm:$0xff]  ;;  %v290_v10 = vld [vmem:[%s1871_s22 + $0x70] sm:$0xff]  ;;  %s2427_s16 = scalar_lea.vmem [#allocation3], %s2410_s15 }
  0x1b   : > { %1474 = vmatprep.subr.mxu0 %v301_v3  ;;  %1516 = vmatprep.subr.mxu1 %v301_v3  ;;  %v279_v11 = vld [vmem:[%s1871_s22 + $0x18] sm:$0xff]  ;;  %v280_v13 = vld [vmem:[%s1871_s22 + $0x20] sm:$0xff]  ;;  %v281_v15 = vld [vmem:[%s1871_s22 + $0x28] sm:$0xff]  ;;  %s1333_s18 = sshll.u32 %s2427_s16, 4  ;;  %s1334_s18 = int_to_ptr.vmem [resolvable:$true] %s1333_s18 }
  0x1c   : > { %1475 = vmatpush3.msra.mxu0 %v301_v3  ;;  %1520 = vmatpush3.msra.mxu1 %v301_v3  ;;  %v291_v12 = vld [vmem:[%s1871_s22 + $0x78] sm:$0xff]  ;;  %v292_v14 = vld [vmem:[%s1871_s22 + $0x80] sm:$0xff]  ;;  %v293_v16 = vld [vmem:[%s1871_s22 + $0x88] sm:$0xff]  ;;  %s1700_s27 = scalar_lea.vmem %s1334_s18, 128  ;;  %p1707_p0 = scmp.lt.s32.totalorder %s1334_s18, %s1705_s29 }
  0x1d   : > { %1476 = vmatprep.subr.mxu0 %v300_v4  ;;  %1517 = vmatprep.subr.mxu1 %v300_v4  ;;  %v282_v17 = vld [vmem:[%s1871_s22 + $0x30] sm:$0xff]  ;;  %v283_v19 = vld [vmem:[%s1871_s22 + $0x38] sm:$0xff]  ;;  %v284_v21 = vld [vmem:[%s1871_s22 + $0x40] sm:$0xff]  ;;  %p1701_p11 = scmp.ne.s32.totalorder %s1334_s18, %s1700_s27  ;;  %p1708_p1 = scmp.lt.s32.totalorder %s1706_s30, %s1700_s27 }
  0x1e   : > { %1477 = vmatpush3.msra.mxu0 %v300_v4  ;;  %1521 = vmatpush3.msra.mxu1 %v300_v4  ;;  %v294_v18 = vld [vmem:[%s1871_s22 + $0x90] sm:$0xff]  ;;  %v295_v20 = vld [vmem:[%s1871_s22 + $0x98] sm:$0xff]  ;;  %v296_v22 = vld [vmem:[%s1871_s22 + $0xa0] sm:$0xff] }
  0x1f   : > { %1478 = vmatprep.mubr.msk.f32.mxu0 %vm2494_vm0, %v276_v5  ;;  %1496 = vmatprep.mubr.msk.f32.mxu1 %vm2494_vm0, %v288_v6  ;;  %v285_v23 = vld [vmem:[%s1871_s22 + $0x48] sm:$0xff]  ;;  %v286_v25 = vld [vmem:[%s1871_s22 + $0x50] sm:$0xff]  ;;  %v287_v27 = vld [vmem:[%s1871_s22 + $0x58] sm:$0xff]  ;;  %p1702_p12 = pnand %p1701_p11, %p1840_p5  ;;  %p1709_p2 = por %p1708_p1, %p1707_p0 }
  0x20   : > { %1479 = vmatmul.mubr.msk.f32.vlgmr.msra.gmra.mxu0 %vm2494_vm0, %v277_v7  ;;  %1497 = vmatmul.mubr.msk.f32.vlgmr.msra.gmra.mxu1 %vm2494_vm0, %v289_v8  ;;  %v297_v24 = vld [vmem:[%s1871_s22 + $0xa8] sm:$0xff]  ;;  %v298_v26 = vld [vmem:[%s1871_s22 + $0xb0] sm:$0xff]  ;;  %v299_v28 = vld [vmem:[%s1871_s22 + $0xb8] sm:$0xff] }
  0x21   : > { %1481 = vmatprep.mubr.msk.f32.mxu0 %vm2494_vm0, %v278_v9  ;;  %1499 = vmatprep.mubr.msk.f32.mxu1 %vm2494_vm0, %v290_v10  ;;  %v1939_v53 = vld [vmem:[%s2491_s4] ss:$0 sm:$0xff]  ;;  %p1703_p13 = pneg %p1702_p12 }
  0x23   : > { %p1710_p3 = pnand %p1709_p2, %p1703_p13 }
  0x24   : > { %1482 = vmatmul.mubr.msk.f32.gmra.mxu0 %vm2494_vm0, %v279_v11  ;;  %1500 = vmatmul.mubr.msk.f32.gmra.mxu1 %vm2494_vm0, %v291_v12 }
  0x25   : > { %1484 = vmatprep.mubr.msk.f32.mxu0 %vm2494_vm0, %v280_v13  ;;  %1502 = vmatprep.mubr.msk.f32.mxu1 %vm2494_vm0, %v292_v14 }
  0x28   : > { %1485 = vmatmul.mubr.msk.f32.gmra.mxu0 %vm2494_vm0, %v281_v15  ;;  %1503 = vmatmul.mubr.msk.f32.gmra.mxu1 %vm2494_vm0, %v293_v16 }
  0x29   : > { %1487 = vmatprep.mubr.msk.f32.mxu0 %vm2494_vm0, %v282_v17  ;;  %1505 = vmatprep.mubr.msk.f32.mxu1 %vm2494_vm0, %v294_v18 }
  0x2c   : > { %1488 = vmatmul.mubr.msk.f32.gmra.mxu0 %vm2494_vm0, %v283_v19  ;;  %1506 = vmatmul.mubr.msk.f32.gmra.mxu1 %vm2494_vm0, %v295_v20 }
  0x2d   : > { %1490 = vmatprep.mubr.msk.f32.mxu0 %vm2494_vm0, %v284_v21  ;;  %1508 = vmatprep.mubr.msk.f32.mxu1 %vm2494_vm0, %v296_v22 }
  0x30   : > { %1491 = vmatmul.mubr.msk.f32.gmra.mxu0 %vm2494_vm0, %v285_v23  ;;  %1509 = vmatmul.mubr.msk.f32.gmra.mxu1 %vm2494_vm0, %v297_v24 }
  0x31   : > { %1493 = vmatprep.mubr.msk.f32.mxu0 %vm2494_vm0, %v286_v25  ;;  %1511 = vmatprep.mubr.msk.f32.mxu1 %vm2494_vm0, %v298_v26 }
  0x34   : > { %1494 = vmatmul.mubr.msk.f32.gmra.mxu0 %vm2494_vm0, %v287_v27  ;;  %1512 = vmatmul.mubr.msk.f32.gmra.mxu1 %vm2494_vm0, %v299_v28 }
  0xe0   : > { %v1480_v30 = vpop.f32.mrf.mxu0  ;;  %v1498_v31 = vpop.f32.mrf.mxu1 }
  0xe1   : > { %v458_v32 = vadd.f32 %v1480_v30, %v1924_v29  ;;  %v518_v33 = vadd.f32 %v1498_v31, %v1924_v29 }
  0xe2   : > { %v452_v34 = vpop.f32.mrf.mxu0  ;;  %v512_v35 = vpop.f32.mrf.mxu1 }
  0xe3   : > { %1564 = vtanh.f32 %v458_v32  ;;  %v453_v36 = vadd.f32 %v1924_v29, %v452_v34  ;;  %v513_v37 = vadd.f32 %v1924_v29, %v512_v35 }
  0xe4   : > { %1566 = vtanh.f32 %v518_v33  ;;  %v1483_v38 = vpop.f32.mrf.mxu0  ;;  %v1501_v39 = vpop.f32.mrf.mxu1 }
  0xe5   : > { %1568 = vtanh.f32 %v453_v36  ;;  %v468_v40 = vadd.f32 %v1483_v38, %v1924_v29  ;;  %v528_v41 = vadd.f32 %v1501_v39, %v1924_v29 }
  0xe6   : > { %1570 = vtanh.f32 %v513_v37  ;;  %v462_v42 = vpop.f32.mrf.mxu0  ;;  %v522_v43 = vpop.f32.mrf.mxu1 }
  0xe7   : > { %1572 = vtanh.f32 %v468_v40  ;;  %v523_v44 = vadd.f32 %v1924_v29, %v522_v43  ;;  %v463_v45 = vadd.f32 %v1924_v29, %v462_v42 }
  0xe8   : > { %1574 = vtanh.f32 %v528_v41  ;;  %v1486_v46 = vpop.f32.mrf.mxu0  ;;  %v1504_v47 = vpop.f32.mrf.mxu1 }
  0xe9   : > { %1576 = vtanh.f32 %v523_v44  ;;  %v478_v50 = vadd.f32 %v1486_v46, %v1924_v29  ;;  %v538_v58 = vadd.f32 %v1504_v47, %v1924_v29 }
  0xea   : > { %v472_v48 = vpop.f32.mrf.mxu0  ;;  %1578 = vtanh.f32 %v463_v45  ;;  %v532_v51 = vpop.f32.mrf.mxu1 }
  0xeb   : > { %v473_v49 = vadd.f32 %v1924_v29, %v472_v48  ;;  %v533_v55 = vadd.f32 %v1924_v29, %v532_v51 }
  0xec   : > { %v1489_v52 = vpop.f32.mrf.mxu0  ;;  %v1507_v56 = vpop.f32.mrf.mxu1 }
  0xed   : > { %1580 = vtanh.f32 %v473_v49  ;;  %v488_v7 = vadd.f32 %v1489_v52, %v1924_v29  ;;  %v548_v17 = vadd.f32 %v1507_v56, %v1924_v29 }
  0xee   : > { %v482_v54 = vpop.f32.mrf.mxu0  ;;  %1582 = vtanh.f32 %v478_v50  ;;  %v542_v4 = vpop.f32.mrf.mxu1 }
  0xef   : > { %1584 = vtanh.f32 %v533_v55  ;;  %v483_v2 = vadd.f32 %v1924_v29, %v482_v54  ;;  %v543_v11 = vadd.f32 %v1924_v29, %v542_v4 }
  0xf0   : > { %v1565_v57 = vpop.eup %1564  ;;  %v1492_v59 = vpop.f32.mrf.mxu0  ;;  %1586 = vtanh.f32 %v538_v58 }
  0xf1   : > { %v1567_v60 = vpop.eup %1566  ;;  %v602_v61 = vmul.f32 %v1565_v57, %v1939_v53  ;;  %1588 = vtanh.f32 %v483_v2  ;;  %v1510_v19 = vpop.f32.mrf.mxu1  ;;  %v498_v26 = vadd.f32 %v1492_v59, %v1924_v29 }
  0xf2   : > { %v1569_v62 = vpop.eup %1568  ;;  %v614_v63 = vmul.f32 %v1567_v60, %v1939_v53  ;;  %v492_v8 = vpop.f32.mrf.mxu0  ;;  %1590 = vtanh.f32 %v488_v7  ;;  %v558_v45 = vadd.f32 %v1510_v19, %v1924_v29 }
  0xf3   : > { %v1571_v0 = vpop.eup %1570  ;;  %v629_v1 = vsel %vm625_vm1, %v602_v61, 0.0  ;;  %v601_v3 = vmul.f32 %v1569_v62, %v1939_v53  ;;  %1592 = vtanh.f32 %v543_v11  ;;  %v493_v23 = vadd.f32 %v1924_v29, %v492_v8  ;;  %v552_v30 = vpop.f32.mrf.mxu1 }
  0xf4   : > { %v1573_v5 = vpop.eup %1572  ;;  %v665_v6 = vsel %vm625_vm1, %v614_v63, 0.0  ;;  %630 = vadd.xlane.f32.xlu0 %v629_v1  ;;  %v613_v15 = vmul.f32 %v1571_v0, %v1939_v53  ;;  %v1495_v18 = vpop.f32.mrf.mxu0  ;;  %1594 = vtanh.f32 %v548_v17  ;;  %v553_v42 = vadd.f32 %v1924_v29, %v552_v30 }
  0xf5   : > { %v1575_v9 = vpop.eup %1574  ;;  %666 = vadd.xlane.f32.xlu1 %v665_v6  ;;  %v604_v10 = vmul.f32 %v1573_v5, %v1939_v53  ;;  %v626_v14 = vsel %vm625_vm1, %v601_v3, 0.0  ;;  %1596 = vtanh.f32 %v493_v23  ;;  %v508_v36 = vadd.f32 %v1495_v18, %v1924_v29  ;;  %v1513_v39 = vpop.f32.mrf.mxu1 }
  0xf6   : > { %v616_v12 = vmul.f32 %v1575_v9, %v1939_v53  ;;  %v1577_v16 = vpop.eup %1576  ;;  %v662_v22 = vsel %vm625_vm1, %v613_v15, 0.0  ;;  %v502_v28 = vpop.f32.mrf.mxu0  ;;  %1598 = vtanh.f32 %v498_v26  ;;  %v568_v55 = vadd.f32 %v1513_v39, %v1924_v29  ;;  %v2017_v39 = vld [vmem:[%s2010_s13 + $0x78] sm:$0xff] }
  0xf7   : > { %v635_v13 = vsel %vm625_vm1, %v604_v10, 0.0  ;;  %v1579_v20 = vpop.eup %1578  ;;  %v615_v24 = vmul.f32 %v1577_v16, %v1939_v53  ;;  %v503_v33 = vadd.f32 %v1924_v29, %v502_v28  ;;  %v562_v48 = vpop.f32.mrf.mxu1  ;;  %vm767_vm7 = vcmp.gt.f32.partialorder %v2017_v39, 0.0 }
  0xf8   : > { %627 = vadd.xlane.f32.xlu0 %v626_v14  ;;  %v671_v21 = vsel %vm625_vm1, %v616_v12, 0.0  ;;  %v603_v27 = vmul.f32 %v1579_v20, %v1939_v53  ;;  %v563_v51 = vadd.f32 %v1924_v29, %v562_v48  ;;  %v2036_v48 = vld [vmem:[%s2010_s13 + $0x38] sm:$0xff] }
  0xf9   : > { %636 = vadd.xlane.f32.xlu1 %v635_v13  ;;  %v668_v32 = vsel %vm625_vm1, %v615_v24, 0.0  ;;  %1600 = vtanh.f32 %v503_v33  ;;  %v1762_v24 = vmov 0   ;;  %vm759_vm13 = vcmp.gt.f32.partialorder %v2036_v48, 0.0 }
  0xfa   : > { %v1581_v25 = vpop.eup %1580  ;;  %v632_v37 = vsel %vm625_vm1, %v603_v27, 0.0  ;;  %1602 = vtanh.f32 %v508_v36  ;;  %1563 = vset.pattern.permute.xlu1 %v1762_v24  ;;  %1562 = vset.pattern.permute.xlu0 %v1762_v24  ;;  %v729_v36 = vld [vmem:[%s2010_s13 + $0x8] sm:$0xff] }
  0xfb   : > { %v1583_v31 = vpop.eup %1582  ;;  %v605_v34 = vmul.f32 %v1581_v25, %v1939_v53  ;;  %1604 = vtanh.f32 %v553_v42  ;;  %v2022_v42 = vld [vmem:[#allocation2] ss:$0 sm:$0xff]  ;;  %vm753_vm4 = vcmp.gt.f32.partialorder %v729_v36, 0.0 }
  0xfc   : > { %663 = vadd.xlane.f32.xlu0 %v662_v22  ;;  %v1585_v35 = vpop.eup %1584  ;;  %v606_v38 = vmul.f32 %v1583_v31, %v1939_v53  ;;  %1606 = vtanh.f32 %v558_v45 }
  0xfd   : > { %672 = vadd.xlane.f32.xlu1 %v671_v21  ;;  %v1587_v40 = vpop.eup %1586  ;;  %v638_v41 = vsel %vm625_vm1, %v605_v34, 0.0  ;;  %v617_v43 = vmul.f32 %v1585_v35, %v1939_v53  ;;  %1608 = vtanh.f32 %v563_v51  ;;  %v741_v35 = vld [vmem:[%s2010_s13 + $0x68] sm:$0xff]  ;;  %v734_v51 = vld [vmem:[%s2010_s13 + $0x30] sm:$0xff] }
  0xfe   : > { %v1589_v44 = vpop.eup %1588  ;;  %v641_v46 = vsel %vm625_vm1, %v606_v38, 0.0  ;;  %v618_v47 = vmul.f32 %v1587_v40, %v1939_v53  ;;  %1610 = vtanh.f32 %v568_v55  ;;  %v728_v38 = vld [vmem:[%s2010_s13] sm:$0xff]  ;;  %vm765_vm2 = vcmp.gt.f32.partialorder %v741_v35, 0.0 }
  0xff   : > { %v1591_v49 = vpop.eup %1590  ;;  %v674_v50 = vsel %vm625_vm1, %v617_v43, 0.0  ;;  %v607_v52 = vmul.f32 %v1589_v44, %v1939_v53  ;;  %v740_v40 = vld [vmem:[%s2010_s13 + $0x60] sm:$0xff]  ;;  %v2025_v43 = vld [vmem:[%s2010_s13 + $0x10] sm:$0xff]  ;;  %vm752_vm6 = vcmp.gt.f32.partialorder %v728_v38, 0.0  ;;  %vm758_vm14 = vcmp.gt.f32.partialorder %v734_v51, 0.0 }
 0x100   : > { %669 = vadd.xlane.f32.xlu0 %v668_v32  ;;  %v1593_v54 = vpop.eup %1592  ;;  %v677_v56 = vsel %vm625_vm1, %v618_v47, 0.0  ;;  %v608_v57 = vmul.f32 %v1591_v49, %v1939_v53  ;;  %v2028_v44 = vld [vmem:[%s2010_s13 + $0x70] sm:$0xff]  ;;  %vm764_vm8 = vcmp.gt.f32.partialorder %v740_v40, 0.0  ;;  %v732_v47 = vld [vmem:[%s2010_s13 + $0x20] sm:$0xff]  ;;  %vm754_vm9 = vcmp.gt.f32.partialorder %v2025_v43, 0.0 }
 0x101   : > { %633 = vadd.xlane.f32.xlu1 %v632_v37  ;;  %v1595_v58 = vpop.eup %1594  ;;  %v644_v59 = vsel %vm625_vm1, %v607_v52, 0.0  ;;  %v619_v60 = vmul.f32 %v1593_v54, %v1939_v53  ;;  %v731_v37 = vld [vmem:[%s2010_s13 + $0x18] sm:$0xff]  ;;  %vm766_vm10 = vcmp.gt.f32.partialorder %v2028_v44, 0.0  ;;  %v2044_v54 = vld [vmem:[%s2010_s13 + $0x48] sm:$0xff]  ;;  %v2047_v55 = vld [vmem:[%s2010_s13 + $0x40] sm:$0xff]  ;;  %vm756_vm12 = vcmp.gt.f32.partialorder %v732_v47, 0.0 }
 0x102   : > { %v1597_v61 = vpop.eup %1596  ;;  %v647_v62 = vsel %vm625_vm1, %v608_v57, 0.0  ;;  %v620_v63 = vmul.f32 %v1595_v58, %v1939_v53  ;;  %vm755_vm5 = vcmp.gt.f32.partialorder %v731_v37, 0.0  ;;  %vm761_vm15 = vcmp.gt.f32.partialorder %v2044_v54, 0.0  ;;  %v2163_v37 = vld [vmem:[%s2010_s13 + $0xb8] sm:$0xff] }
 0x103   : > { %v1599_v29 = vpop.eup %1598  ;;  %v680_v0 = vsel %vm625_vm1, %v619_v60, 0.0  ;;  %v609_v1 = vmul.f32 %v1597_v61, %v1939_v53 }
 0x104   : > { %639 = vadd.xlane.f32.xlu0 %v638_v41  ;;  %v683_v3 = vsel %vm625_vm1, %v620_v63, 0.0  ;;  %v610_v4 = vmul.f32 %v1599_v29, %v1939_v53  ;;  %v2059_v63 = vld [vmem:[%s2010_s13 + $0x58] sm:$0xff] }
 0x105   : > { %642 = vadd.xlane.f32.xlu1 %v641_v46  ;;  %v650_v6 = vsel %vm625_vm1, %v609_v1, 0.0  ;;  %v733_v46 = vld [vmem:[%s2010_s13 + $0x28] sm:$0xff]  ;;  %v2066_v1 = vld [vmem:[%s2010_s13 + $0x90] sm:$0xff] }
 0x106   : > { %v1601_v2 = vpop.eup %1600  ;;  %v653_v9 = vsel %vm625_vm1, %v610_v4, 0.0  ;;  %vm757_vm11 = vcmp.gt.f32.partialorder %v733_v46, 0.0 }
 0x107   : > { %v1603_v5 = vpop.eup %1602  ;;  %v611_v7 = vmul.f32 %v1601_v2, %v1939_v53 }
 0x108   : > { %675 = vadd.xlane.f32.xlu0 %v674_v50  ;;  %v1605_v8 = vpop.eup %1604  ;;  %v612_v10 = vmul.f32 %v1603_v5, %v1939_v53 }
 0x109   : > { %678 = vadd.xlane.f32.xlu1 %v677_v56  ;;  %v1607_v11 = vpop.eup %1606  ;;  %v656_v12 = vsel %vm625_vm1, %v611_v7, 0.0  ;;  %v621_v13 = vmul.f32 %v1605_v8, %v1939_v53  ;;  %v2082_v7 = vld [vmem:[%s2010_s13 + $0xa0] sm:$0xff] }
 0x10a   : > { %v1609_v14 = vpop.eup %1608  ;;  %v659_v15 = vsel %vm625_vm1, %v612_v10, 0.0  ;;  %v622_v16 = vmul.f32 %v1607_v11, %v1939_v53 }
 0x10b   : > { %v1611_v17 = vpop.eup %1610  ;;  %v686_v18 = vsel %vm625_vm1, %v621_v13, 0.0  ;;  %v623_v19 = vmul.f32 %v1609_v14, %v1939_v53 }
 0x10c   : > { %645 = vadd.xlane.f32.xlu0 %v644_v59  ;;  %v689_v20 = vsel %vm625_vm1, %v622_v16, 0.0  ;;  %v624_v21 = vmul.f32 %v1611_v17, %v1939_v53  ;;  %v2053_v59 = vld [vmem:[%s2010_s13 + $0x80] sm:$0xff]  ;;  %v2105_v17 = vld [vmem:[%s2010_s13 + $0x98] sm:$0xff] }
 0x10d   : > { %648 = vadd.xlane.f32.xlu1 %v647_v62  ;;  %v692_v22 = vsel %vm625_vm1, %v623_v19, 0.0  ;;  %vm768_vm0 = vcmp.gt.f32.partialorder %v2053_v59, 0.0 }
 0x10e   : > { %v695_v23 = vsel %vm625_vm1, %v624_v21, 0.0  ;;  %vm760_vm1 = vcmp.gt.f32.partialorder %v2047_v55, 0.0 }
 0x110   : > { %681 = vadd.xlane.f32.xlu0 %v680_v0  ;;  %v2063_v0 = vld [vmem:[%s2010_s13 + $0x88] sm:$0xff] }
 0x111   : > { %684 = vadd.xlane.f32.xlu1 %v683_v3 }
 0x114   : > { %651 = vadd.xlane.f32.xlu0 %v650_v6  ;;  %v2079_v6 = vld [vmem:[%s2010_s13 + $0x50] sm:$0xff] }
 0x115   : > { %654 = vadd.xlane.f32.xlu1 %v653_v9 }
 0x118   : > { %657 = vadd.xlane.f32.xlu0 %v656_v12 }
 0x119   : > { %660 = vadd.xlane.f32.xlu1 %v659_v15 }
 0x11c   : > { %687 = vadd.xlane.f32.xlu0 %v686_v18  ;;  %v2108_v18 = vld [vmem:[%s2010_s13 + $0xa8] sm:$0xff] }
 0x11d   : > { %690 = vadd.xlane.f32.xlu1 %v689_v20 }
 0x120   : > { %693 = vadd.xlane.f32.xlu0 %v692_v22 }
 0x121   : > { %696 = vadd.xlane.f32.xlu1 %v695_v23 }
 0x17d   : > { %v631_v25 = vpop.xlane.xlu0 %630 }
 0x17e   : > { %v667_v26 = vpop.xlane.xlu1 %666  ;;  %v705_v50 = vadd.f32 %v2022_v42, %v631_v25 }
 0x17f   : > { %v717_v49 = vadd.f32 %v2022_v42, %v667_v26 }
 0x180   : > { %v2074_v3 = vsel %vm753_vm4, %v705_v50, -1e+09  ;;  %vm769_vm4 = vcmp.gt.f32.partialorder %v2063_v0, 0.0 }
 0x181   : > { %v628_v27 = vpop.xlane.xlu0 %627  ;;  %v2071_v2 = vsel %vm765_vm2, %v717_v49, -1e+09  ;;  %vm763_vm2 = vcmp.gt.f32.partialorder %v2059_v63, 0.0  ;;  %v802_v20 = vsel %vm800_vm3, %v2074_v3, -inf }
 0x182   : > { %v637_v28 = vpop.xlane.xlu1 %636  ;;  %v704_v57 = vadd.f32 %v2022_v42, %v628_v27  ;;  %v2112_v19 = vsel %vm800_vm3, %v2071_v2, -inf }
 0x183   : > { %v707_v56 = vadd.f32 %v2022_v42, %v637_v28 }
 0x184   : > { %v2088_v9 = vsel %vm752_vm6, %v704_v57, -1e+09  ;;  %vm770_vm6 = vcmp.gt.f32.partialorder %v2066_v1, 0.0 }
 0x185   : > { %v664_v30 = vpop.xlane.xlu0 %663  ;;  %v2085_v8 = vsel %vm755_vm5, %v707_v56, -1e+09  ;;  %vm762_vm5 = vcmp.gt.f32.partialorder %v2079_v6, 0.0  ;;  %v801_v23 = vsel %vm800_vm3, %v2088_v9, -inf }
 0x186   : > { %v673_v31 = vpop.xlane.xlu1 %672  ;;  %v716_v61 = vadd.f32 %v2022_v42, %v664_v30  ;;  %v804_v22 = vsel %vm800_vm3, %v2085_v8, -inf }
 0x187   : > { %v719_v29 = vadd.f32 %v2022_v42, %v673_v31 }
 0x188   : > { %v2096_v13 = vsel %vm764_vm8, %v716_v61, -1e+09  ;;  %vm771_vm8 = vcmp.gt.f32.partialorder %v2105_v17, 0.0 }
 0x189   : > { %v670_v32 = vpop.xlane.xlu0 %669  ;;  %v2118_v21 = vsel %vm767_vm7, %v719_v29, -1e+09  ;;  %vm772_vm7 = vcmp.gt.f32.partialorder %v2082_v7, 0.0  ;;  %v2136_v27 = vsel %vm800_vm3, %v2096_v13, -inf }
 0x18a   : > { %v2003_v33 = vpop.xlane.xlu1 %633  ;;  %v718_v4 = vadd.f32 %v2022_v42, %v670_v32 }
 0x18b   : > { %v706_v14 = vadd.f32 %v2022_v42, %v2003_v33  ;;  %v2147_v33 = vld [vmem:[%s2010_s13 + $0xb0] sm:$0xff] }
 0x18c   : > { %v2128_v24 = vsel %vm766_vm10, %v718_v4, -1e+09  ;;  %vm773_vm10 = vcmp.gt.f32.partialorder %v2108_v18, 0.0 }
 0x18d   : > { %v640_v53 = vpop.xlane.xlu0 %639  ;;  %v825_v38 = vsel %vm800_vm3, %v2128_v24, -inf }
 0x18e   : > { %v643_v34 = vpop.xlane.xlu1 %642  ;;  %v708_v58 = vadd.f32 %v2022_v42, %v640_v53  ;;  %v2151_v53 = vsel %vm800_vm3, %v2118_v21, -inf }
 0x18f   : > { %v709_v62 = vadd.f32 %v2022_v42, %v643_v34  ;;  %v2155_v34 = vsel %vm754_vm9, %v706_v14, -1e+09  ;;  %vm774_vm9 = vcmp.gt.f32.partialorder %v2147_v33, 0.0 }
 0x190   : > { %v2091_v10 = vsel %vm756_vm12, %v708_v58, -1e+09  ;;  %v803_v54 = vsel %vm800_vm3, %v2155_v34, -inf }
 0x191   : > { %v2020_v41 = vpop.xlane.xlu0 %675  ;;  %v2101_v15 = vsel %vm757_vm11, %v709_v62, -1e+09  ;;  %v805_v25 = vsel %vm800_vm3, %v2091_v10, -inf  ;;  %vm775_vm11 = vcmp.gt.f32.partialorder %v2163_v37, 0.0 }
 0x192   : > { %v2030_v45 = vpop.xlane.xlu1 %678  ;;  %v807_v28 = vsel %vm800_vm3, %v2101_v15, -inf  ;;  %v806_v39 = vmax.f32 %v801_v23, %v805_v25  ;;  %v720_v40 = vadd.f32 %v2022_v42, %v2020_v41 }
 0x193   : > { %v808_v44 = vmax.f32 %v802_v20, %v807_v28  ;;  %v721_v56 = vadd.f32 %v2022_v42, %v2030_v45 }
 0x195   : > { %v646_v52 = vpop.xlane.xlu0 %645 }
 0x196   : > { %v649_v60 = vpop.xlane.xlu1 %648  ;;  %v710_v11 = vadd.f32 %v2022_v42, %v646_v52 }
 0x197   : > { %v711_v16 = vadd.f32 %v2022_v42, %v649_v60  ;;  %v2195_v60 = vsel %vm768_vm0, %v720_v40, -1e+09  ;;  %vm2497_vm0 = vcmask 261120  }
 0x198   : > { %v2141_v30 = vsel %vm758_vm14, %v710_v11, -1e+09  ;;  %vm2499_vm12 = vmmov %vm2497_vm0 }
 0x199   : > { %v682_v5 = vpop.xlane.xlu0 %681  ;;  %v2159_v35 = vsel %vm759_vm13, %v711_v16, -1e+09  ;;  %v809_v46 = vsel %vm800_vm3, %v2141_v30, -inf  ;;  %vm2500_vm13 = vmmov %vm2497_vm0 }
 0x19a   : > { %v685_v12 = vpop.xlane.xlu1 %684  ;;  %v811_v41 = vsel %vm800_vm3, %v2159_v35, -inf  ;;  %v810_v61 = vmax.f32 %v803_v54, %v809_v46  ;;  %v722_v62 = vadd.f32 %v2022_v42, %v682_v5  ;;  %vm2501_vm14 = vmmov %vm2497_vm0 }
 0x19b   : > { %v812_v4 = vmax.f32 %v804_v22, %v811_v41  ;;  %v723_v11 = vadd.f32 %v2022_v42, %v685_v12  ;;  %v2215_v12 = vsel %vm769_vm4, %v721_v56, -1e+09  ;;  %vm2505_vm4 = vmmov %vm2497_vm0 }
 0x19d   : > { %v652_v26 = vpop.xlane.xlu0 %651  ;;  %v2231_v0 = vsel %vm771_vm8, %v723_v11, -1e+09  ;;  %vm2509_vm8 = vmmov %vm2497_vm0 }
 0x19e   : > { %v655_v31 = vpop.xlane.xlu1 %654  ;;  %v712_v32 = vadd.f32 %v2022_v42, %v652_v26  ;;  %v829_v26 = vsel %vm800_vm3, %v2195_v60, -inf  ;;  %v835_v46 = vsel %vm800_vm3, %v2231_v0, -inf }
 0x19f   : > { %v713_v36 = vadd.f32 %v2022_v42, %v655_v31 }
 0x1a0   : > { %v2171_v43 = vsel %vm760_vm1, %v712_v32, -1e+09  ;;  %vm2503_vm1 = vmmov %vm2497_vm0 }
 0x1a1   : > { %v2177_v47 = vsel %vm761_vm15, %v713_v36, -1e+09  ;;  %v813_v48 = vsel %vm800_vm3, %v2171_v43, -inf  ;;  %v658_v49 = vpop.xlane.xlu0 %657  ;;  %vm2502_vm15 = vmmov %vm2497_vm0 }
 0x1a2   : > { %v815_v50 = vsel %vm800_vm3, %v2177_v47, -inf  ;;  %v814_v51 = vmax.f32 %v806_v39, %v813_v48  ;;  %v661_v52 = vpop.xlane.xlu1 %660  ;;  %v714_v55 = vadd.f32 %v2022_v42, %v658_v49 }
 0x1a3   : > { %v816_v57 = vmax.f32 %v808_v44, %v815_v50  ;;  %v715_v58 = vadd.f32 %v2022_v42, %v661_v52 }
 0x1a4   : > { %v2200_v29 = vsel %vm762_vm5, %v714_v55, -1e+09  ;;  %v822_v16 = vmax.f32 %v814_v51, %v2136_v27  ;;  %v2223_v27 = vsel %vm770_vm6, %v722_v62, -1e+09  ;;  %vm2506_vm5 = vmmov %vm2497_vm0 }
 0x1a5   : > { %v2205_v45 = vsel %vm763_vm2, %v715_v58, -1e+09  ;;  %v817_v14 = vsel %vm800_vm3, %v2200_v29, -inf  ;;  %v688_v59 = vpop.xlane.xlu0 %687  ;;  %v824_v63 = vmax.f32 %v816_v57, %v2112_v19  ;;  %v833_v44 = vsel %vm800_vm3, %v2223_v27, -inf  ;;  %vm2504_vm2 = vmmov %vm2497_vm0 }
 0x1a6   : > { %v819_v5 = vsel %vm800_vm3, %v2205_v45, -inf  ;;  %v818_v20 = vmax.f32 %v810_v61, %v817_v14  ;;  %v691_v6 = vpop.xlane.xlu1 %690  ;;  %v724_v23 = vadd.f32 %v2022_v42, %v688_v59  ;;  %v830_v39 = vmax.f32 %v822_v16, %v829_v26  ;;  %vm2507_vm6 = vmmov %vm2497_vm0 }
 0x1a7   : > { %v820_v22 = vmax.f32 %v812_v4, %v819_v5  ;;  %v725_v25 = vadd.f32 %v2022_v42, %v691_v6 }
 0x1a8   : > { %v826_v28 = vmax.f32 %v818_v20, %v825_v38  ;;  %v2227_v31 = vsel %vm772_vm7, %v724_v23, -1e+09  ;;  %v831_v38 = vsel %vm800_vm3, %v2215_v12, -inf  ;;  %vm2508_vm7 = vmmov %vm2497_vm0 }
 0x1a9   : > { %v828_v19 = vmax.f32 %v820_v22, %v2151_v53  ;;  %v797_v32 = vsel %vm773_vm10, %v725_v25, -1e+09  ;;  %v837_v36 = vsel %vm800_vm3, %v2227_v31, -inf  ;;  %v694_v1 = vpop.xlane.xlu0 %693  ;;  %v832_v53 = vmax.f32 %v824_v63, %v831_v38 }
 0x1aa   : > { %v839_v7 = vsel %vm800_vm3, %v797_v32, -inf  ;;  %v697_v40 = vpop.xlane.xlu1 %696  ;;  %v726_v17 = vadd.f32 %v2022_v42, %v694_v1  ;;  %v838_v48 = vmax.f32 %v830_v39, %v837_v36  ;;  %v834_v49 = vmax.f32 %v826_v28, %v833_v44 }
 0x1ab   : > { %v727_v18 = vadd.f32 %v2022_v42, %v697_v40  ;;  %v840_v50 = vmax.f32 %v832_v53, %v839_v7  ;;  %v836_v51 = vmax.f32 %v828_v19, %v835_v46  ;;  %vm1100_vm10 = vcmask 253952  }
 0x1ac   : > { %v798_v41 = vsel %vm774_vm9, %v726_v17, -1e+09  ;;  %vm2510_vm9 = vmmov %vm2497_vm0 }
 0x1ad   : > { %v799_v52 = vsel %vm775_vm11, %v727_v18, -1e+09  ;;  %v841_v55 = vsel %vm800_vm3, %v798_v41, -inf  ;;  %v845_v42 = vmax.f32 %v838_v48, %v840_v50  ;;  %vm2511_vm11 = vmmov %vm2497_vm0 }
 0x1ae   : > { %v843_v54 = vsel %vm800_vm3, %v799_v52, -inf  ;;  %v842_v56 = vmax.f32 %v834_v49, %v841_v55 }
 0x1af   : > { %v844_v57 = vmax.f32 %v836_v51, %v843_v54 }
 0x1b1   : > { %v846_v58 = vmax.f32 %v842_v56, %v844_v57 }
 0x1b3   : > { %v847_v61 = vmax.f32 %v845_v42, %v846_v58 }
 0x1b5   : > { %v848_v62 = vrot.slane %v847_v61, 4 }
 0x1b7   : > { %v849_v4 = vmax.f32 %v847_v61, %v848_v62 }
 0x1b9   : > { %v850_v11 = vrot.slane %v849_v4, 2 }
 0x1bb   : > { %v851_v14 = vmax.f32 %v849_v4, %v850_v11 }
 0x1bd   : > { %v852_v33 = vrot.slane %v851_v14, 1 }
 0x1bf   : > { %v2253_v59 = vmax.f32 %v851_v14, %v852_v33 }
 0x1c1   : > { %v855_v37 = vsub.f32 %v2074_v3, %v2253_v59  ;;  %v854_v16 = vsub.f32 %v2088_v9, %v2253_v59  ;;  %v856_v5 = vsub.f32 %v2155_v34, %v2253_v59  ;;  %v857_v20 = vsub.f32 %v2085_v8, %v2253_v59 }
 0x1c2   : > { %v863_v63 = vsub.f32 %v2177_v47, %v2253_v59  ;;  %v858_v22 = vsub.f32 %v2091_v10, %v2253_v59  ;;  %v859_v9 = vsub.f32 %v2101_v15, %v2253_v59  ;;  %v866_v34 = vsub.f32 %v2096_v13, %v2253_v59 }
 0x1c3   : > { %v880_v6 = vmul.f32 1.442695, %v855_v37  ;;  %v878_v23 = vmul.f32 1.442695, %v854_v16  ;;  %v882_v25 = vmul.f32 1.442695, %v856_v5  ;;  %v876_v8 = vsub.f32 %v798_v41, %v2253_v59 }
 0x1c4   : > { %v884_v3 = vmul.f32 1.442695, %v857_v20  ;;  %v896_v26 = vmul.f32 1.442695, %v863_v63  ;;  %v886_v28 = vmul.f32 1.442695, %v858_v22  ;;  %v875_v47 = vsub.f32 %v797_v32, %v2253_v59 }
 0x1c5   : > { %1612 = vpow2.f32 %v880_v6  ;;  %v869_v10 = vsub.f32 %v2118_v21, %v2253_v59  ;;  %v888_v19 = vmul.f32 1.442695, %v859_v9  ;;  %v902_v36 = vmul.f32 1.442695, %v866_v34 }
 0x1c6   : > { %1614 = vpow2.f32 %v878_v23  ;;  %v872_v15 = vsub.f32 %v2223_v27, %v2253_v59  ;;  %v922_v1 = vmul.f32 1.442695, %v876_v8  ;;  %v860_v13 = vsub.f32 %v2141_v30, %v2253_v59 }
 0x1c7   : > { %1616 = vpow2.f32 %v882_v25  ;;  %v873_v38 = vsub.f32 %v2231_v0, %v2253_v59  ;;  %v920_v7 = vmul.f32 1.442695, %v875_v47  ;;  %v865_v32 = vsub.f32 %v2205_v45, %v2253_v59 }
 0x1c8   : > { %1618 = vpow2.f32 %v884_v3  ;;  %v908_v39 = vmul.f32 1.442695, %v869_v10  ;;  %v864_v21 = vsub.f32 %v2200_v29, %v2253_v59  ;;  %v874_v27 = vsub.f32 %v2227_v31, %v2253_v59 }
 0x1c9   : > { %1620 = vpow2.f32 %v896_v26  ;;  %v914_v40 = vmul.f32 1.442695, %v872_v15  ;;  %v877_v17 = vsub.f32 %v799_v52, %v2253_v59  ;;  %v890_v30 = vmul.f32 1.442695, %v860_v13 }
 0x1ca   : > { %1622 = vpow2.f32 %v886_v28  ;;  %v871_v0 = vsub.f32 %v2215_v12, %v2253_v59  ;;  %v900_v44 = vmul.f32 1.442695, %v865_v32  ;;  %v870_v45 = vsub.f32 %v2195_v60, %v2253_v59 }
 0x1cb   : > { %1624 = vpow2.f32 %v888_v19  ;;  %v898_v53 = vmul.f32 1.442695, %v864_v21  ;;  %v924_v31 = vmul.f32 1.442695, %v877_v17  ;;  %v861_v60 = vsub.f32 %v2159_v35, %v2253_v59 }
 0x1cc   : > { %1626 = vpow2.f32 %v902_v36  ;;  %v912_v46 = vmul.f32 1.442695, %v871_v0  ;;  %v910_v12 = vmul.f32 1.442695, %v870_v45  ;;  %v916_v49 = vmul.f32 1.442695, %v873_v38 }
 0x1cd   : > { %1628 = vpow2.f32 %v922_v1  ;;  %v918_v52 = vmul.f32 1.442695, %v874_v27  ;;  %v862_v54 = vsub.f32 %v2171_v43, %v2253_v59  ;;  %v892_v56 = vmul.f32 1.442695, %v861_v60 }
 0x1ce   : > { %1630 = vpow2.f32 %v920_v7  ;;  %v867_v35 = vsub.f32 %v2071_v2, %v2253_v59  ;;  %v868_v23 = vsub.f32 %v2128_v24, %v2253_v59 }
 0x1cf   : > { %1632 = vpow2.f32 %v908_v39  ;;  %v894_v43 = vmul.f32 1.442695, %v862_v54 }
 0x1d0   : > { %1634 = vpow2.f32 %v914_v40  ;;  %v904_v2 = vmul.f32 1.442695, %v867_v35  ;;  %v906_v10 = vmul.f32 1.442695, %v868_v23 }
 0x1d1   : > { %1636 = vpow2.f32 %v890_v30 }
 0x1d2   : > { %v2292_v29 = vpop.eup %1612  ;;  %1638 = vpow2.f32 %v900_v44 }
 0x1d3   : > { %v2294_v18 = vpop.eup %1614  ;;  %933 = vperm.xlu1 %1563, %v2292_v29   ;;  %1640 = vpow2.f32 %v898_v53  ;;  %v1082_v0 = vsel %vm800_vm3, %v2292_v29, 0.0 }
 0x1d4   : > { %928 = vperm.xlu0 %1562, %v2294_v18   ;;  %v2298_v48 = vpop.eup %1616  ;;  %1642 = vpow2.f32 %v924_v31  ;;  %v1081_v30 = vsel %vm800_vm3, %v2294_v18, 0.0 }
 0x1d5   : > { %v1619_v41 = vpop.eup %1618  ;;  %1644 = vpow2.f32 %v912_v46  ;;  %v1083_v18 = vadd.f32 %v1082_v0, %v1081_v30 }
 0x1d6   : > { %v1621_v50 = vpop.eup %1620  ;;  %v1113_v51 = vsel %vm800_vm3, %v1619_v41, 0.0  ;;  %1646 = vpow2.f32 %v910_v12 }
 0x1d7   : > { %938 = vperm.xlu1 %1563, %v2298_v48   ;;  %v1623_v55 = vpop.eup %1622  ;;  %1648 = vpow2.f32 %v916_v49  ;;  %v1175_v22 = vsel %vm800_vm3, %v1621_v50, 0.0 }
 0x1d8   : > { %973 = vperm.xlu0 %1562, %v1621_v50   ;;  %v1114_v57 = vsel %vm800_vm3, %v1623_v55, 0.0  ;;  %v1625_v42 = vpop.eup %1624  ;;  %1650 = vpow2.f32 %v918_v52 }
 0x1d9   : > { %v1115_v58 = vadd.f32 %v1114_v57, %v1113_v51  ;;  %v2309_v61 = vpop.eup %1626  ;;  %v1116_v62 = vsel %vm800_vm3, %v1625_v42, 0.0  ;;  %1652 = vpow2.f32 %v892_v56 }
 0x1da   : > { %v2312_v4 = vpop.eup %1628  ;;  %1654 = vpow2.f32 %v894_v43  ;;  %v1206_v43 = vsel %vm800_vm3, %v2309_v61, 0.0 }
 0x1db   : > { %943 = vperm.xlu1 %1563, %v1619_v41   ;;  %v1117_v11 = vadd.f32 %v1116_v62, %v1115_v58  ;;  %v1631_v14 = vpop.eup %1630  ;;  %v1300_v20 = vsel %vm800_vm3, %v2312_v4, 0.0  ;;  %1656 = vpow2.f32 %v904_v2 }
 0x1dc   : > { %988 = vperm.xlu0 %1562, %v2309_v61   ;;  %v1633_v33 = vpop.eup %1632  ;;  %v1299_v5 = vsel %vm800_vm3, %v1631_v14, 0.0  ;;  %1658 = vpow2.f32 %v906_v10 }
 0x1dd   : > { %v1118_v37 = vrot.slane %v1117_v11, 4  ;;  %v1635_v16 = vpop.eup %1634  ;;  %v1301_v9 = vadd.f32 %v1300_v20, %v1299_v5  ;;  %v1237_v47 = vsel %vm800_vm3, %v1633_v33, 0.0 }
 0x1de   : > { %v1637_v6 = vpop.eup %1636  ;;  %v1268_v36 = vsel %vm800_vm3, %v1635_v16, 0.0 }
 0x1df   : > { %948 = vperm.xlu1 %1563, %v1623_v55   ;;  %v1639_v63 = vpop.eup %1638  ;;  %v1119_v3 = vadd.f32 %v1118_v37, %v1117_v11  ;;  %v1144_v52 = vsel %vm800_vm3, %v1637_v6, 0.0 }
 0x1e0   : > { %1003 = vperm.xlu0 %1562, %v1633_v33   ;;  %v1641_v25 = vpop.eup %1640  ;;  %v1178_v24 = vsel %vm800_vm3, %v1639_v63, 0.0 }
 0x1e1   : > { %v1643_v26 = vpop.eup %1642  ;;  %v1176_v34 = vsel %vm800_vm3, %v1641_v25, 0.0  ;;  %v1120_v1 = vrot.slane %v1119_v3, 2 }
 0x1e2   : > { %v1645_v8 = vpop.eup %1644  ;;  %v1177_v28 = vadd.f32 %v1176_v34, %v1175_v22  ;;  %v1302_v59 = vsel %vm800_vm3, %v1643_v26, 0.0 }
 0x1e3   : > { %953 = vperm.xlu1 %1563, %v1625_v42   ;;  %v2323_v19 = vpop.eup %1646  ;;  %v1303_v7 = vadd.f32 %v1302_v59, %v1301_v9  ;;  %v1240_v40 = vsel %vm800_vm3, %v1645_v8, 0.0  ;;  %v1121_v53 = vadd.f32 %v1120_v1, %v1119_v3  ;;  %v1084_v42 = vsel %vm800_vm3, %v2298_v48, 0.0 }
 0x1e4   : > { %1018 = vperm.xlu0 %1562, %v1635_v16   ;;  %v2328_v15 = vpop.eup %1648  ;;  %v1179_v13 = vadd.f32 %v1178_v24, %v1177_v28  ;;  %v1238_v38 = vsel %vm800_vm3, %v2323_v19, 0.0  ;;  %v1085_v58 = vadd.f32 %v1084_v42, %v1083_v18 }
 0x1e5   : > { %v1239_v32 = vadd.f32 %v1238_v38, %v1237_v47  ;;  %v1269_v39 = vsel %vm800_vm3, %v2328_v15, 0.0  ;;  %v2334_v21 = vpop.eup %1650  ;;  %v1304_v46 = vrot.slane %v1303_v7, 4  ;;  %v1122_v55 = vrot.slane %v1121_v53, 1 }
 0x1e6   : > { %v1180_v27 = vrot.slane %v1179_v13, 4  ;;  %v1270_v44 = vadd.f32 %v1269_v39, %v1268_v36  ;;  %v1653_v45 = vpop.eup %1652  ;;  %v1271_v12 = vsel %vm800_vm3, %v2334_v21, 0.0  ;;  %v1086_v20 = vrot.slane %v1085_v58, 4 }
 0x1e7   : > { %958 = vperm.xlu1 %1563, %v1637_v6   ;;  %v1241_v17 = vadd.f32 %v1240_v40, %v1239_v32  ;;  %v1655_v50 = vpop.eup %1654  ;;  %v1305_v56 = vadd.f32 %v1304_v46, %v1303_v7  ;;  %v1145_v35 = vsel %vm800_vm3, %v1653_v45, 0.0 }
 0x1e8   : > { %1033 = vperm.xlu0 %1562, %v1631_v14   ;;  %v1181_v31 = vadd.f32 %v1180_v27, %v1179_v13  ;;  %v2343_v49 = vadd.f32 %v1271_v12, %v1270_v44  ;;  %v1657_v29 = vpop.eup %1656  ;;  %v1146_v62 = vadd.f32 %v1145_v35, %v1144_v52  ;;  %v1123_v14 = vadd.f32 %v1122_v55, %v1121_v53  ;;  %v1676_v35 = vld [vmem:[%s1871_s22 + $0x20] sm:$0xff] }
 0x1e9   : > { %v1242_v60 = vrot.slane %v1241_v17, 4  ;;  %v1207_v11 = vsel %vm800_vm3, %v1657_v29, 0.0  ;;  %v1306_v37 = vrot.slane %v1305_v56, 2  ;;  %v1147_v16 = vsel %vm800_vm3, %v1655_v50, 0.0  ;;  %v1659_v5 = vpop.eup %1658 }
 0x1ea   : > { %v1182_v41 = vrot.slane %v1181_v31, 2  ;;  %v1148_v6 = vadd.f32 %v1147_v16, %v1146_v62  ;;  %v1208_v23 = vadd.f32 %v1207_v11, %v1206_v43  ;;  %v1124_v48 = vmax.f32 %v1123_v14, 1e-30  ;;  %v1678_v43 = vld [vmem:[%s1871_s22 + $0x28] sm:$0xff] }
 0x1eb   : > { %963 = vperm.xlu1 %1563, %v1653_v45   ;;  %v1243_v51 = vadd.f32 %v1242_v60, %v1241_v17  ;;  %v1307_v3 = vadd.f32 %v1306_v37, %v1305_v56  ;;  %v1209_v61 = vsel %vm800_vm3, %v1659_v5, 0.0  ;;  %v1087_v9 = vadd.f32 %v1086_v20, %v1085_v58  ;;  %v1677_v58 = vld [vmem:[%s1871_s22 + $0x18] sm:$0xff]  ;;  %vm2498_vm3 = vmmov %vm2497_vm0 }
 0x1ec   : > { %983 = vperm.xlu0 %1562, %v1639_v63   ;;  %v1183_v54 = vadd.f32 %v1182_v41, %v1181_v31  ;;  %v1149_v34 = vrot.slane %v1148_v6, 4  ;;  %v1273_v7 = vrot.slane %v2343_v49, 4 }
 0x1ed   : > { %v1244_v57 = vrot.slane %v1243_v51, 2  ;;  %v1088_v47 = vrot.slane %v1087_v9, 2 }
 0x1ee   : > { %v1184_v2 = vrot.slane %v1183_v54, 1  ;;  %v1150_v10 = vadd.f32 %v1149_v34, %v1148_v6  ;;  %v1274_v40 = vadd.f32 %v1273_v7, %v2343_v49  ;;  %v1680_v34 = vld [vmem:[%s1871_s22 + $0x58] sm:$0xff] }
 0x1ef   : > { %968 = vperm.xlu1 %1563, %v1655_v50   ;;  %v1245_v33 = vadd.f32 %v1244_v57, %v1243_v51  ;;  %v1089_v1 = vadd.f32 %v1088_v47, %v1087_v9 }
 0x1f0   : > { %1013 = vperm.xlu0 %1562, %v1645_v8   ;;  %v1185_v63 = vadd.f32 %v1184_v2, %v1183_v54  ;;  %v1210_v8 = vadd.f32 %v1209_v61, %v1208_v23  ;;  %v1151_v13 = vrot.slane %v1150_v10, 2 }
 0x1f1   : > { %v1246_v22 = vrot.slane %v1245_v33, 1  ;;  %v1090_v39 = vrot.slane %v1089_v1, 1 }
 0x1f2   : > { %v1186_v28 = vmax.f32 %v1185_v63, 1e-30  ;;  %v1211_v24 = vrot.slane %v1210_v8, 4 }
 0x1f3   : > { %978 = vperm.xlu1 %1563, %v1641_v25   ;;  %v1247_v25 = vadd.f32 %v1246_v22, %v1245_v33  ;;  %v1091_v17 = vadd.f32 %v1090_v39, %v1089_v1 }
 0x1f4   : > { %1043 = vperm.xlu0 %1562, %v1643_v26   ;;  %v1308_v26 = vrot.slane %v1307_v3, 1  ;;  %v1212_v38 = vadd.f32 %v1211_v24, %v1210_v8 }
 0x1f5   : > { %v1248_v59 = vmax.f32 %v1247_v25, 1e-30  ;;  %v1092_v44 = vmax.f32 %v1091_v17, 1e-30 }
 0x1f6   : > { %v1309_v36 = vadd.f32 %v1308_v26, %v1307_v3  ;;  %v1213_v27 = vrot.slane %v1212_v38, 2  ;;  %v1679_v3 = vld [vmem:[%s1871_s22 + $0x48] sm:$0xff] }
 0x1f7   : > { %993 = vperm.xlu1 %1563, %v1657_v29  }
 0x1f8   : > { %1127 = vperm.xlu0 %1562, %v1124_v48   ;;  %v1310_v32 = vmax.f32 %v1309_v36, 1e-30  ;;  %v1214_v0 = vadd.f32 %v1213_v27, %v1212_v38 }
 0x1fa   : > { %v1215_v53 = vrot.slane %v1214_v0, 1 }
 0x1fb   : > { %1008 = vperm.xlu1 %1563, %v2323_v19   ;;  %v1152_v19 = vadd.f32 %v1151_v13, %v1150_v10  ;;  %v1682_v10 = vld [vmem:[%s1871_s22 + $0x8] sm:$0xff] }
 0x1fc   : > { %1189 = vperm.xlu0 %1562, %v1186_v28   ;;  %v1681_v28 = vld [vmem:[%s1871_s22 + $0x50] sm:$0xff] }
 0x1fd   : > { %v1153_v30 = vrot.slane %v1152_v19, 1 }
 0x1ff   : > { %1023 = vperm.xlu1 %1563, %v2328_v15   ;;  %v1275_v15 = vrot.slane %v1274_v40, 2  ;;  %v1154_v45 = vadd.f32 %v1153_v30, %v1152_v19 }
 0x200   : > { %1251 = vperm.xlu0 %1562, %v1248_v59   ;;  %v1683_v59 = vld [vmem:[%s1871_s22] sm:$0xff] }
 0x201   : > { %v1276_v31 = vadd.f32 %v1275_v15, %v1274_v40  ;;  %v1155_v46 = vmax.f32 %v1154_v45, 1e-30  ;;  %v1685_v15 = vld [vmem:[%s1871_s22 + $0x78] sm:$0xff] }
 0x203   : > { %1038 = vperm.xlu1 %1563, %v2312_v4   ;;  %v1216_v4 = vadd.f32 %v1215_v53, %v1214_v0  ;;  %v1277_v12 = vrot.slane %v1276_v31, 1 }
 0x204   : > { %1313 = vperm.xlu0 %1562, %v1310_v32   ;;  %v1684_v32 = vld [vmem:[%s1871_s22 + $0x10] sm:$0xff] }
 0x205   : > { %v1217_v60 = vmax.f32 %v1216_v4, 1e-30  ;;  %v1278_v41 = vadd.f32 %v1277_v12, %v1276_v31  ;;  %v1687_v12 = vld [vmem:[%s1871_s22 + $0x80] sm:$0xff] }
 0x207   : > { %998 = vperm.xlu1 %1563, %v1659_v5   ;;  %v1279_v49 = vmax.f32 %v1278_v41, 1e-30 }
 0x20b   : > { %1028 = vperm.xlu1 %1563, %v2334_v21  }
 0x20f   : > { %1095 = vperm.xlu1 %1563, %v1092_v44  }
 0x213   : > { %1158 = vperm.xlu1 %1563, %v1155_v46   ;;  %v1686_v46 = vld [vmem:[%s1871_s22 + $0x88] sm:$0xff] }
 0x217   : > { %1220 = vperm.xlu1 %1563, %v1217_v60  }
 0x21b   : > { %1282 = vperm.xlu1 %1563, %v1279_v49  }
 0x24e   : > { %v934_v50 = vpop.permute.xlu1 %933 }
 0x24f   : > { %v929_v51 = vpop.permute.xlu0 %928  ;;  %v1047_v24 = vmul.f32 %v1682_v10, %v934_v50 }
 0x250   : > { %v1046_v36 = vmul.f32 %v1683_v59, %v929_v51 }
 0x251   : > { %v1071_v30 = vsel %vm2503_vm1, %v1047_v24, 0.0  ;;  %vm2517_vm1 = vmmov %vm2497_vm0 }
 0x252   : > { %v939_v21 = vpop.permute.xlu1 %938  ;;  %v1070_v0 = vsel %vm2504_vm2, %v1046_v36, 0.0  ;;  %vm2518_vm2 = vmmov %vm2497_vm0 }
 0x253   : > { %v974_v18 = vpop.permute.xlu0 %973  ;;  %v1048_v39 = vmul.f32 %v1684_v32, %v939_v21  ;;  %v1072_v49 = vadd.f32 %v1071_v30, %v1070_v0  ;;  %v1697_v0 = vld [vmem:[%s1871_s22 + $0x90] sm:$0xff] }
 0x254   : > { %v1055_v61 = vmul.f32 %v1679_v3, %v974_v18 }
 0x255   : > { %v1073_v31 = vsel %vm2505_vm4, %v1048_v39, 0.0  ;;  %vm2519_vm4 = vmmov %vm2497_vm0 }
 0x256   : > { %v944_v52 = vpop.permute.xlu1 %943  ;;  %v1164_v1 = vsel %vm2500_vm13, %v1055_v61, 0.0  ;;  %vm2514_vm13 = vmmov %vm2497_vm0 }
 0x257   : > { %v2360_v29 = vpop.permute.xlu0 %988  ;;  %v1049_v62 = vmul.f32 %v1677_v58, %v944_v52  ;;  %v2393_v52 = vadd.f32 %v1073_v31, %v1072_v49  ;;  %v1689_v58 = vld [vmem:[%s1871_s22 + $0x60] sm:$0xff] }
 0x259   : > { %v1102_v37 = vsel %vm2498_vm3, %v1049_v62, 0.0  ;;  %v1058_v62 = vmul.f32 %v1689_v58, %v2360_v29  ;;  %v1693_v29 = vld [vmem:[%s1871_s22 + $0x68] sm:$0xff]  ;;  %vm2512_vm3 = vmmov %vm2497_vm0 }
 0x25a   : > { %v949_v55 = vpop.permute.xlu1 %948 }
 0x25b   : > { %v1004_v54 = vpop.permute.xlu0 %1003  ;;  %v1050_v57 = vmul.f32 %v1676_v35, %v949_v55  ;;  %v1688_v55 = vld [vmem:[%s1871_s22 + $0x38] sm:$0xff] }
 0x25c   : > { %v1061_v44 = vmul.f32 %v1685_v15, %v1004_v54 }
 0x25d   : > { %v1103_v2 = vsel %vm2497_vm0, %v1050_v57, 0.0 }
 0x25e   : > { %v954_v56 = vpop.permute.xlu1 %953  ;;  %v1104_v5 = vadd.f32 %v1103_v2, %v1102_v37  ;;  %v1226_v21 = vsel %vm2506_vm5, %v1061_v44, 0.0  ;;  %v1691_v2 = vld [vmem:[%s1871_s22 + $0x40] sm:$0xff] }
 0x25f   : > { %v2363_v42 = vpop.permute.xlu0 %1018  ;;  %v1051_v11 = vmul.f32 %v1678_v43, %v954_v56  ;;  %v1690_v43 = vld [vmem:[%s1871_s22 + $0x30] sm:$0xff] }
 0x260   : > { %v1064_v15 = vmul.f32 %v1697_v0, %v2363_v42 }
 0x261   : > { %v1105_v16 = vsel %vm2499_vm12, %v1051_v11, 0.0  ;;  %vm2513_vm12 = vmmov %vm2497_vm0 }
 0x262   : > { %v2367_v14 = vpop.permute.xlu1 %958  ;;  %v1106_v23 = vadd.f32 %v1105_v16, %v1104_v5  ;;  %v1257_v58 = vsel %vm2518_vm2, %v1064_v15, 0.0 }
 0x263   : > { %v2370_v33 = vpop.permute.xlu0 %1033  ;;  %v1052_v11 = vmul.f32 %v1690_v43, %v2367_v14  ;;  %v1075_v14 = vrot.slane %v2393_v52, 4 }
 0x264   : > { %v1107_v22 = vrot.slane %v1106_v23, 4 }
 0x266   : > { %v964_v20 = vpop.permute.xlu1 %963  ;;  %v1108_v47 = vadd.f32 %v1107_v22, %v1106_v23 }
 0x267   : > { %v984_v6 = vpop.permute.xlu0 %983  ;;  %v1053_v54 = vmul.f32 %v1688_v55, %v964_v20 }
 0x268   : > { %v1057_v8 = vmul.f32 %v1680_v34, %v984_v6  ;;  %v1109_v40 = vrot.slane %v1108_v47, 2  ;;  %v1195_v34 = vsel %vm2510_vm9, %v1058_v62, 0.0 }
 0x269   : > { %v1134_v61 = vsel %vm2509_vm8, %v1053_v54, 0.0 }
 0x26a   : > { %v969_v48 = vpop.permute.xlu1 %968  ;;  %v1167_v19 = vsel %vm2502_vm15, %v1057_v8, 0.0  ;;  %v1110_v50 = vadd.f32 %v1109_v40, %v1108_v47  ;;  %v1133_v8 = vsel %vm2511_vm11, %v1052_v11, 0.0  ;;  %vm2516_vm15 = vmmov %vm2497_vm0 }
 0x26b   : > { %v1014_v63 = vpop.permute.xlu0 %1013  ;;  %v1054_v37 = vmul.f32 %v1691_v2, %v969_v48 }
 0x26c   : > { %v1063_v4 = vmul.f32 %v1686_v46, %v1014_v63  ;;  %v1111_v6 = vrot.slane %v1110_v50, 1  ;;  %v1692_v63 = vld [vmem:[%s1871_s22 + $0xa8] sm:$0xff] }
 0x26d   : > { %v1067_v22 = vmul.f32 %v1692_v63, %v2370_v33  ;;  %v1136_v24 = vsel %vm2497_vm0, %v1054_v37, 0.0 }
 0x26e   : > { %v979_v9 = vpop.permute.xlu1 %978  ;;  %v1229_v16 = vsel %vm2508_vm7, %v1063_v4, 0.0  ;;  %v1112_v10 = vadd.f32 %v1111_v6, %v1110_v50 }
 0x26f   : > { %v1056_v25 = vmul.f32 %v1681_v28, %v979_v9  ;;  %v2377_v26 = vpop.permute.xlu0 %1043  ;;  %v1694_v28 = vld [vmem:[%s1871_s22 + $0xb8] sm:$0xff] }
 0x270   : > { %v1069_v33 = vmul.f32 %v1694_v28, %v2377_v26 }
 0x271   : > { %v1165_v13 = vsel %vm2501_vm14, %v1056_v25, 0.0  ;;  %v1695_v25 = vld [vmem:[%s1871_s22 + $0xb0] sm:$0xff]  ;;  %vm2515_vm14 = vmmov %vm2497_vm0 }
 0x272   : > { %v1166_v38 = vadd.f32 %v1165_v13, %v1164_v1  ;;  %v994_v7 = vpop.permute.xlu1 %993  ;;  %v1288_v13 = vsel %vm2512_vm3, %v1067_v22, 0.0 }
 0x273   : > { %v1128_v27 = vpop.permute.xlu0 %1127  ;;  %v1059_v3 = vmul.f32 %v1693_v29, %v994_v7 }
 0x274   : > { %v1168_v17 = vadd.f32 %v1167_v19, %v1166_v38  ;;  %1660 = vrcp.f32 %v1128_v27  ;;  %v1135_v38 = vadd.f32 %v1134_v61, %v1133_v8  ;;  %v1696_v27 = vld [vmem:[%s1871_s22 + $0x98] sm:$0xff] }
 0x275   : > { %v1196_v7 = vsel %vm2513_vm12, %v1059_v3, 0.0 }
 0x276   : > { %v1169_v45 = vrot.slane %v1168_v17, 4  ;;  %v1009_v53 = vpop.permute.xlu1 %1008  ;;  %v1137_v44 = vadd.f32 %v1136_v24, %v1135_v38  ;;  %v1197_v42 = vadd.f32 %v1196_v7, %v1195_v34 }
 0x277   : > { %v1062_v60 = vmul.f32 %v1687_v12, %v1009_v53  ;;  %v1190_v41 = vpop.permute.xlu0 %1189  ;;  %v1698_v53 = vld [vmem:[%s1871_s22 + $0x70] sm:$0xff] }
 0x278   : > { %v1170_v51 = vadd.f32 %v1169_v45, %v1168_v17  ;;  %1662 = vrcp.f32 %v1190_v41  ;;  %v1291_v45 = vsel %vm2515_vm14, %v1069_v33, 0.0  ;;  %v1076_v41 = vadd.f32 %v1075_v14, %v2393_v52 }
 0x279   : > { %v1227_v18 = vsel %vm2507_vm6, %v1062_v60, 0.0  ;;  %v1138_v54 = vrot.slane %v1137_v44, 4 }
 0x27a   : > { %v1171_v56 = vrot.slane %v1170_v51, 2  ;;  %v1228_v35 = vadd.f32 %v1227_v18, %v1226_v21  ;;  %v1024_v57 = vpop.permute.xlu1 %1023  ;;  %v1077_v37 = vrot.slane %v1076_v41, 2 }
 0x27b   : > { %v1252_v5 = vpop.permute.xlu0 %1251  ;;  %v1065_v40 = vmul.f32 %v1696_v27, %v1024_v57 }
 0x27c   : > { %v1172_v20 = vadd.f32 %v1171_v56, %v1170_v51  ;;  %v1230_v23 = vadd.f32 %v1229_v16, %v1228_v35  ;;  %1664 = vrcp.f32 %v1252_v5  ;;  %v1699_v35 = vld [vmem:[%s1871_s22 + $0xa0] sm:$0xff]  ;;  %v1078_v29 = vadd.f32 %v1077_v37, %v1076_v41  ;;  %s1320_s22 = scalar_lea.sflag [#allocation4], %s261_s14 }
 0x27d   : > { %v1258_v21 = vsel %vm2517_vm1, %v1065_v40, 0.0 }
 0x27e   : > { %v1231_v48 = vrot.slane %v1230_v23, 4  ;;  %v1039_v9 = vpop.permute.xlu1 %1038  ;;  %v1173_v59 = vrot.slane %v1172_v20, 1  ;;  %v1259_v11 = vadd.f32 %v1258_v21, %v1257_v58  ;;  %v1079_v28 = vrot.slane %v1078_v29, 1 }
 0x27f   : > { %v1068_v47 = vmul.f32 %v1695_v25, %v1039_v9  ;;  %v1314_v39 = vpop.permute.xlu0 %1313 }
 0x280   : > { %v1232_v36 = vadd.f32 %v1231_v48, %v1230_v23  ;;  %v1174_v46 = vadd.f32 %v1173_v59, %v1172_v20  ;;  %1666 = vrcp.f32 %v1314_v39  ;;  %v1139_v20 = vadd.f32 %v1138_v54, %v1137_v44 }
 0x281   : > { %v1661_v1 = vpop.eup %1660  ;;  %v1289_v32 = vsel %vm2514_vm13, %v1068_v47, 0.0  ;;  %v1080_v59 = vadd.f32 %v1079_v28, %v1078_v29 }
 0x282   : > { %v1131_v26 = vmul.f32 %v1661_v1, %v1112_v10  ;;  %v1233_v19 = vrot.slane %v1232_v36, 2  ;;  %v1290_v17 = vadd.f32 %v1289_v32, %v1288_v13  ;;  %v999_v30 = vpop.permute.xlu1 %998  ;;  %v1140_v61 = vrot.slane %v1139_v20, 2 }
 0x283   : > { %v1060_v31 = vmul.f32 %v1698_v53, %v999_v30 }
 0x284   : > { %1132 = vst.msk [vmem:[%s2427_s16 + $0x1] sm:$0x1] %vm1100_vm10, %v1131_v26  ;;  %v1234_v4 = vadd.f32 %v1233_v19, %v1232_v36  ;;  %v1292_v12 = vadd.f32 %v1291_v45, %v1290_v17  ;;  %v1141_v47 = vadd.f32 %v1140_v61, %v1139_v20 }
 0x285   : > { %v1663_v60 = vpop.eup %1662  ;;  %v1198_v49 = vsel %vm2516_vm15, %v1060_v31, 0.0 }
 0x286   : > { %v1235_v50 = vrot.slane %v1234_v4, 1  ;;  %v1193_v51 = vmul.f32 %v1663_v60, %v1174_v46  ;;  %v1293_v18 = vrot.slane %v1292_v12, 4  ;;  %v1029_v55 = vpop.permute.xlu1 %1028  ;;  %v1199_v56 = vadd.f32 %v1198_v49, %v1197_v42 }
 0x287   : > { %v1066_v57 = vmul.f32 %v1699_v35, %v1029_v55  ;;  %v1142_v1 = vrot.slane %v1141_v47, 1 }
 0x288   : > { %v1236_v62 = vadd.f32 %v1235_v50, %v1234_v4  ;;  %1194 = vst.msk [vmem:[%s2427_s16 + $0x3] sm:$0x1] %vm1100_vm10, %v1193_v51  ;;  %v1294_v52 = vadd.f32 %v1293_v18, %v1292_v12  ;;  %v1200_v23 = vrot.slane %v1199_v56, 4 }
 0x289   : > { %v1665_v43 = vpop.eup %1664  ;;  %v1260_v2 = vsel %vm2519_vm4, %v1066_v57, 0.0  ;;  %v1143_v39 = vadd.f32 %v1142_v1, %v1141_v47 }
 0x28a   : > { %v1255_v16 = vmul.f32 %v1665_v43, %v1236_v62  ;;  %v1295_v5 = vrot.slane %v1294_v52, 2  ;;  %v1096_v6 = vpop.permute.xlu1 %1095  ;;  %v1261_v63 = vadd.f32 %v1260_v2, %v1259_v11  ;;  %v1201_v48 = vadd.f32 %v1200_v23, %v1199_v56 }
 0x28b   : > { %1668 = vrcp.f32 %v1096_v6 }
 0x28c   : > { %1256 = vst.msk [vmem:[%s2427_s16 + $0x5] sm:$0x1] %vm1100_vm10, %v1255_v16  ;;  %v1296_v22 = vadd.f32 %v1295_v5, %v1294_v52  ;;  %v1262_v9 = vrot.slane %v1261_v63, 4  ;;  %v1202_v10 = vrot.slane %v1201_v48, 2 }
 0x28d   : > { %v1667_v8 = vpop.eup %1666 }
 0x28e   : > { %v1297_v3 = vrot.slane %v1296_v22, 1  ;;  %v1159_v14 = vpop.permute.xlu1 %1158  ;;  %v1263_v24 = vadd.f32 %v1262_v9, %v1261_v63  ;;  %v1203_v13 = vadd.f32 %v1202_v10, %v1201_v48 }
 0x28f   : > { %1670 = vrcp.f32 %v1159_v14 }
 0x290   : > { %v1298_v34 = vadd.f32 %v1297_v3, %v1296_v22  ;;  %v1264_v38 = vrot.slane %v1263_v24, 2  ;;  %v1204_v26 = vrot.slane %v1203_v13, 1 }
 0x292   : > { %v1317_v33 = vmul.f32 %v1667_v8, %v1298_v34  ;;  %v1221_v25 = vpop.permute.xlu1 %1220  ;;  %v1265_v19 = vadd.f32 %v1264_v38, %v1263_v24  ;;  %v1205_v17 = vadd.f32 %v1204_v26, %v1203_v13 }
 0x293   : > { %1672 = vrcp.f32 %v1221_v25 }
 0x294   : > { %1318 = vst.msk [vmem:[%s2427_s16 + $0x7] sm:$0x1] %vm1100_vm10, %v1317_v33  ;;  %v1266_v30 = vrot.slane %v1265_v19, 1 }
 0x296   : > { %v1283_v36 = vpop.permute.xlu1 %1282  ;;  %v1267_v44 = vadd.f32 %v1266_v30, %v1265_v19 }
 0x297   : > { %1674 = vrcp.f32 %v1283_v36 }
 0x298   : > { %v1669_v7 = vpop.eup %1668 }
 0x299   : > { %v1099_v32 = vmul.f32 %v1669_v7, %v1080_v59 }
 0x29b   : > { %1101 = vst.msk [vmem:[%s2427_s16] sm:$0x1] %vm1100_vm10, %v1099_v32 }
 0x29c   : > { %v1671_v27 = vpop.eup %1670 }
 0x29d   : > { %v1162_v40 = vmul.f32 %v1671_v27, %v1143_v39 }
 0x29f   : > { %1163 = vst.msk [vmem:[%s2427_s16 + $0x2] sm:$0x1] %vm1100_vm10, %v1162_v40 }
 0x2a0   : > { %v1673_v0 = vpop.eup %1672 }
 0x2a1   : > { %v1224_v15 = vmul.f32 %v1673_v0, %v1205_v17 }
 0x2a3   : > { %1225 = vst.msk [vmem:[%s2427_s16 + $0x4] sm:$0x1] %vm1100_vm10, %v1224_v15 }
 0x2a4   : > { %v1675_v45 = vpop.eup %1674 }
 0x2a5   : > { %v1286_v53 = vmul.f32 %v1675_v45, %v1267_v44 }
 0x2a7   : > { %1287 = vst.msk [vmem:[%s2427_s16 + $0x6] sm:$0x1] %vm1100_vm10, %v1286_v53 }
 0x2a8   : > { %1713 = shalt.err (!%p1710_p3)
}
 0x2a9   : > { %s1714_s10 = scalar_lea.hbm %s1331_s21, 128  ;;  %s1718_s13 = scalar_lea.hbm %s2493_s6, 512 }
 0x2aa   : > { %p1715_p4 = scmp.ne.s32.totalorder %s1331_s21, %s1714_s10  ;;  %p1719_p9 = scmp.lt.s32.totalorder %s1331_s21, %s2493_s6 }
 0x2ab   : > { %p1720_p10 = scmp.lt.s32.totalorder %s1718_s13, %s1714_s10 }
 0x2ac   : > { %p1716_p7 = pnand %p1715_p4, %p1840_p5 }
 0x2ad   : > { %p1721_p11 = por %p1720_p10, %p1719_p9 }
 0x2ae   : > { %p1717_p8 = pneg %p1716_p7 }
 0x2b0   : > { %p1722_p12 = pnand %p1721_p11, %p1717_p8 }
 0x2b2   : > { %1725 = shalt.err (!%p1722_p12)
}
 0x2b3   : > { %1522 = dma.vmem_to_hbm [thread:$0]  (%p1840_p5), %s1334_s18, 128, %s1331_s21, %s1320_s22  }
 0x2b4 PF: > { %p1528_p13 = scmp.ge.s32.totalorder %s1760_s26, 2  ;;  %s1345_s16 = sand.u32 1, %s1748_s23  }
 0x2b5   : > { %s1346_s17 = scalar_lea.sflag [#allocation4], %s1345_s16 }
 0x2b6   : > { %p1525_p0 = pnand %p1528_p13, %p1844_p6 }
 0x2b8   : > { %p1526_p1 = pneg %p1525_p0 }
 0x2ba   : > { %1743 = dma.done.wait (%p1526_p1), %s1346_s17, 128  }
 0x2bb   : > { %1745 = vsyncadd (%p1526_p1), %s1346_s17, 4294967168  ;;  %p18_p2 = scmp.ge.s32.totalorder %s1827_s28, 6   ;;  %s2520_s23 = smov %s1752_s24 }
 0x2bc   : > { %s2521_s24 = smov %s1756_s25  ;;  %s2522_s25 = smov %s1838_s7 }
 0x2bd   : > { %s2523_s26 = smov %s1827_s28  ;;  %20 = sbr.rel (!%p18_p2) target bundleno = 6 (0x6), region = 82 }
 0x2c2   :  { %1351 = vsyncpa [#allocation4], 1 }
 0x2c3   :  { %1353 = vsyncpa [#allocation4 + $0x1], 1 }

</bundles_post_ra>
